<compile_context>
chip_gen: v7x
topology: tpu7x:2x2x1
jax: 0.10.0
libtpu: 0.0.40
codegen_flags: <defaults>
</compile_context>

<pallas_src>
import functools
import math

import jax
import jax.numpy as jnp
from jax.experimental import pallas as pl
from jax.experimental.pallas import tpu as pltpu

# ---- small synthetic BERT config (bert-base structure, shrunk) -------------------
VOCAB = 100
SEQ = 8             # models.Transformer(..., max_seq_length=128) -> small seq here
HIDDEN = 128        # bert-base uses 768; 128 keeps one full lane-width tile
NUM_HEADS = 2
HEAD_DIM = HIDDEN // NUM_HEADS
INTERMEDIATE = 4 * HIDDEN
NUM_LAYERS = 2
LN_EPS = 1e-12


# ------------------------------ kernel ---------------------------------------------
def _layernorm(x, gamma, beta):
    mean = jnp.mean(x, axis=-1, keepdims=True)
    var = jnp.mean(jnp.square(x - mean), axis=-1, keepdims=True)
    return (x - mean) * jax.lax.rsqrt(var + LN_EPS) * gamma + beta


def fused_bert_kernel(x_emb_ref, mask_ref, pool_ref, eg_ref, eb_ref,
                      wqkv_ref, bqkv_ref, wo_ref, bo_ref, g1_ref, b1_ref,
                      wi_ref, bi_ref, wo2_ref, bo2_ref, g2_ref, b2_ref,
                      tok_ref, pooled_ref, *, num_heads, head_dim, hidden):
    layer = pl.program_id(1)

    # ---- layer 0 prologue: embedding LayerNorm (f32 stats) into the resident activation block
    @pl.when(layer == 0)
    def _():
        tok_ref[...] = _layernorm(x_emb_ref[...], eg_ref[...], eb_ref[...])

    x = tok_ref[...]                                    # (S, H) f32, resident across layers
    x_bf = x.astype(jnp.bfloat16)

    # ---- fused lane-dense QKV projection: one (S,H)@(H,3H) matmul, unmasked 384-wide output
    qkv = jnp.dot(x_bf, wqkv_ref[...],
                  preferred_element_type=jnp.float32) + bqkv_ref[...]     # (S, 3H) f32

    # ---- additive key bias built in-kernel from the (1, S) mask row: 0 valid / -1e9 pad
    bias = (mask_ref[...] - 1.0) * 1e9                  # (1, S), broadcasts over query rows

    scale = 1.0 / math.sqrt(head_dim)
    ctx_heads = []
    for h in range(num_heads):                          # static unroll (small NH)
        q = qkv[:, h * head_dim:(h + 1) * head_dim]
        k = qkv[:, hidden + h * head_dim: hidden + (h + 1) * head_dim]
        v = qkv[:, 2 * hidden + h * head_dim: 2 * hidden + (h + 1) * head_dim]
        s = jnp.dot(q, k.T, preferred_element_type=jnp.float32) * scale + bias   # (S, S)
        s = s - jnp.max(s, axis=-1, keepdims=True)
        p = jnp.exp(s)
        p = p / jnp.sum(p, axis=-1, keepdims=True)      # exact softmax denominator (f32)
        ctx_heads.append(jnp.dot(p, v, preferred_element_type=jnp.float32))      # (S, HD)

    # heads stacked along lanes -> one full-depth (S,H)@(H,H) output projection
    ctx = jnp.concatenate(ctx_heads, axis=-1)           # (S, H)
    attn = jnp.dot(ctx.astype(jnp.bfloat16), wo_ref[...],
                   preferred_element_type=jnp.float32) + bo_ref[...]

    h1 = _layernorm(x + attn, g1_ref[...], b1_ref[...])

    # ---- feed-forward
    ff = jnp.dot(h1.astype(jnp.bfloat16), wi_ref[...],
                 preferred_element_type=jnp.float32) + bi_ref[...]
    # TODO(synk): HF bert-base uses exact erf GELU; tanh approximation used here.
    ff = jax.nn.gelu(ff, approximate=True)
    ff = jnp.dot(ff.astype(jnp.bfloat16), wo2_ref[...],
                 preferred_element_type=jnp.float32) + bo2_ref[...]
    out = _layernorm(h1 + ff, g2_ref[...], b2_ref[...])
    tok_ref[...] = out

    # ---- last-layer epilogue: masked mean pooling as a single (1,S)@(S,H) MXU dot
    @pl.when(layer == pl.num_programs(1) - 1)
    def _():
        pooled_ref[...] = jnp.dot(pool_ref[...], out,
                                  preferred_element_type=jnp.float32).astype(pooled_ref.dtype)


# ------------------------------ pallas_call wrapper --------------------------------
def _const_spec(shape):
    nd = len(shape)
    return pl.BlockSpec(shape, lambda b, l, _nd=nd: (0,) * _nd)


def _per_batch_spec(shape):
    rest = tuple(shape[1:])
    nz = len(rest)
    return pl.BlockSpec((None,) + rest, lambda b, l, _nz=nz: (b,) + (0,) * _nz)


def _per_layer_spec(shape):
    rest = tuple(shape[1:])
    nz = len(rest)
    return pl.BlockSpec((None,) + rest, lambda b, l, _nz=nz: (l,) + (0,) * _nz)


def run_fused_bert(x_emb, mask, pool_w, emb_g, emb_b, kparams):
    B, S, H = x_emb.shape
    L = kparams["wqkv"].shape[0]
    kernel = functools.partial(fused_bert_kernel, num_heads=NUM_HEADS,
                               head_dim=HEAD_DIM, hidden=HIDDEN)

    layer_order = ("wqkv", "bqkv", "wo", "bo", "g1", "b1",
                   "wi", "bi", "wo2", "bo2", "g2", "b2")
    layer_args = [kparams[k] for k in layer_order]

    in_specs = ([_per_batch_spec(x_emb.shape),
                 _per_batch_spec(mask.shape),
                 _per_batch_spec(pool_w.shape),
                 _const_spec(emb_g.shape),
                 _const_spec(emb_b.shape)]
                + [_per_layer_spec(a.shape) for a in layer_args])

    out_shape = (jax.ShapeDtypeStruct((B, S, H), jnp.float32),
                 jax.ShapeDtypeStruct((B, 1, H), jnp.float32))
    out_specs = (pl.BlockSpec((None, S, H), lambda b, l: (b, 0, 0)),
                 pl.BlockSpec((None, 1, H), lambda b, l: (b, 0, 0)))

    tokens, pooled = pl.pallas_call(
        kernel,
        out_shape=out_shape,
        grid=(B, L),
        in_specs=in_specs,
        out_specs=out_specs,
        compiler_params=pltpu.CompilerParams(
            dimension_semantics=("parallel", "arbitrary")),
    )(x_emb, mask, pool_w, emb_g, emb_b, *layer_args)
    return tokens, pooled


# ------------------------------ parameters -----------------------------------------
def init_params(key):
    def normal(k, shape, scale=0.02):
        return (scale * jax.random.normal(k, shape)).astype(jnp.float32)

    keys = jax.random.split(key, 4)
    params = {
        "word_emb": normal(keys[0], (VOCAB, HIDDEN)),
        "pos_emb":  normal(keys[1], (SEQ, HIDDEN)),
        "type_emb": normal(keys[2], (2, HIDDEN)),
        "emb_g": jnp.ones((1, HIDDEN), jnp.float32),
        "emb_b": jnp.zeros((1, HIDDEN), jnp.float32),
        "layers": [],
    }
    lkeys = jax.random.split(keys[3], NUM_LAYERS)
    for l in range(NUM_LAYERS):
        lk = jax.random.split(lkeys[l], 6)
        params["layers"].append(dict(
            wq=normal(lk[0], (HIDDEN, HIDDEN)), bq=jnp.zeros((HIDDEN,), jnp.float32),
            wk=normal(lk[1], (HIDDEN, HIDDEN)), bk=jnp.zeros((HIDDEN,), jnp.float32),
            wv=normal(lk[2], (HIDDEN, HIDDEN)), bv=jnp.zeros((HIDDEN,), jnp.float32),
            wo=normal(lk[3], (HIDDEN, HIDDEN)), bo=jnp.zeros((HIDDEN,), jnp.float32),
            g1=jnp.ones((HIDDEN,), jnp.float32), b1=jnp.zeros((HIDDEN,), jnp.float32),
            wi=normal(lk[4], (HIDDEN, INTERMEDIATE)), bi=jnp.zeros((INTERMEDIATE,), jnp.float32),
            wo2=normal(lk[5], (INTERMEDIATE, HIDDEN)), bo2=jnp.zeros((HIDDEN,), jnp.float32),
            g2=jnp.ones((HIDDEN,), jnp.float32), b2=jnp.zeros((HIDDEN,), jnp.float32),
        ))
    return params


def prep_kernel_params(params):
    """Stack per-layer weights into [L, ...] kernel layout (fused lane-dense QKV, bf16 matmuls)."""
    acc = {k: [] for k in ("wqkv", "bqkv", "wo", "bo", "g1", "b1",
                           "wi", "bi", "wo2", "bo2", "g2", "b2")}
    for lp in params["layers"]:
        # fused (H, 3H) QKV weight; head columns stay contiguous per projection
        acc["wqkv"].append(jnp.concatenate([lp["wq"], lp["wk"], lp["wv"]], axis=1))
        acc["bqkv"].append(jnp.concatenate([lp["bq"], lp["bk"], lp["bv"]],
                                           axis=0).reshape(1, 3 * HIDDEN))
        acc["wo"].append(lp["wo"])                                   # (H, H) full depth
        acc["bo"].append(lp["bo"].reshape(1, HIDDEN))
        acc["g1"].append(lp["g1"].reshape(1, HIDDEN))
        acc["b1"].append(lp["b1"].reshape(1, HIDDEN))
        acc["wi"].append(lp["wi"])
        acc["bi"].append(lp["bi"].reshape(1, INTERMEDIATE))
        acc["wo2"].append(lp["wo2"])
        acc["bo2"].append(lp["bo2"].reshape(1, HIDDEN))
        acc["g2"].append(lp["g2"].reshape(1, HIDDEN))
        acc["b2"].append(lp["b2"].reshape(1, HIDDEN))

    stk = lambda xs: jnp.stack(xs, axis=0)
    bf16_keys = {"wqkv", "wo", "wi", "wo2"}
    return {k: stk(v).astype(jnp.bfloat16 if k in bf16_keys else jnp.float32)
            for k, v in acc.items()}


# ------------------------------ forward ---------------------------------------------
@jax.jit
def sts_bert_forward(params, kparams, input_ids, attention_mask):
    """Mirrors SentenceTransformer([Transformer, Pooling]) forward.

    Returns dict with 'token_embeddings' [B,S,H] and 'sentence_embedding' [B,H].
    """
    B, S = input_ids.shape

    # embedding lookup (gather) + position + token-type embeddings: glue in JAX, kept f32
    emb = (params["word_emb"][input_ids]
           + params["pos_emb"][None, :S, :]
           + params["type_emb"][0][None, None, :])                  # (B, S, H) f32

    mask = attention_mask.astype(jnp.float32)                       # (B, S)
    counts = jnp.maximum(jnp.sum(mask, axis=1, keepdims=True), 1e-9)
    pool_w = (mask / counts)[:, None, :]                            # (B, 1, S) mean-pool weights
    mask_in = mask[:, None, :]                                      # (B, 1, S) key-valid row

    tokens, pooled = run_fused_bert(emb, mask_in, pool_w,
                                    params["emb_g"], params["emb_b"], kparams)

    return {"token_embeddings": tokens,
            "sentence_embedding": pooled[:, 0, :]}


if __name__ == "__main__":
    key = jax.random.PRNGKey(0)
    pkey, ikey = jax.random.split(key)
    params = init_params(pkey)
    kparams = prep_kernel_params(params)

    B = 2
    input_ids = jax.random.randint(ikey, (B, SEQ), 0, VOCAB, dtype=jnp.int32)
    attention_mask = jnp.array([[1] * SEQ, [1] * 6 + [0] * 2], dtype=jnp.int32)

    out = sts_bert_forward(params, kparams, input_ids, attention_mask)
    jax.block_until_ready(out)

    assert out["token_embeddings"].shape == (B, SEQ, HIDDEN)
    assert out["sentence_embedding"].shape == (B, HIDDEN)
    assert bool(jnp.all(jnp.isfinite(out["token_embeddings"])))
    assert bool(jnp.all(jnp.isfinite(out["sentence_embedding"])))
    print("KERNEL_OK")
</pallas_src>

<mosaic_0001>
module attributes {stable_mosaic.version = 11 : i64} {
  func.func @fused_bert_kernel(%arg0: i32, %arg1: i32, %arg2: memref<1x8x128xf32, #tpu.memory_space<vmem>>, %arg3: memref<1x1x8xf32, #tpu.memory_space<vmem>>, %arg4: memref<1x1x8xf32, #tpu.memory_space<vmem>>, %arg5: memref<1x128xf32, #tpu.memory_space<vmem>>, %arg6: memref<1x128xf32, #tpu.memory_space<vmem>>, %arg7: memref<1x128x384xbf16, #tpu.memory_space<vmem>>, %arg8: memref<1x1x384xf32, #tpu.memory_space<vmem>>, %arg9: memref<1x128x128xbf16, #tpu.memory_space<vmem>>, %arg10: memref<1x1x128xf32, #tpu.memory_space<vmem>>, %arg11: memref<1x1x128xf32, #tpu.memory_space<vmem>>, %arg12: memref<1x1x128xf32, #tpu.memory_space<vmem>>, %arg13: memref<1x128x512xbf16, #tpu.memory_space<vmem>>, %arg14: memref<1x1x512xf32, #tpu.memory_space<vmem>>, %arg15: memref<1x512x128xbf16, #tpu.memory_space<vmem>>, %arg16: memref<1x1x128xf32, #tpu.memory_space<vmem>>, %arg17: memref<1x1x128xf32, #tpu.memory_space<vmem>>, %arg18: memref<1x1x128xf32, #tpu.memory_space<vmem>>, %arg19: memref<1x8x128xf32, #tpu.memory_space<vmem>>, %arg20: memref<1x1x128xf32, #tpu.memory_space<vmem>>) attributes {dimension_semantics = [#tpu.dimension_semantics<parallel>, #tpu.dimension_semantics<arbitrary>], iteration_bounds = array<i64: 2, 2>, scalar_prefetch = 0 : i64, scratch_operands = 0 : i64, tpu.core_type = #tpu.core_type<tc>, window_params = [{transform_indices = @transform_0, window_bounds = array<i64: 1, 8, 128>}, {transform_indices = @transform_1, window_bounds = array<i64: 1, 1, 8>}, {transform_indices = @transform_2, window_bounds = array<i64: 1, 1, 8>}, {pipeline_mode = #tpu.pipeline_mode<synchronous>, transform_indices = @transform_3, window_bounds = array<i64: 1, 128>}, {pipeline_mode = #tpu.pipeline_mode<synchronous>, transform_indices = @transform_4, window_bounds = array<i64: 1, 128>}, {transform_indices = @transform_5, window_bounds = array<i64: 1, 128, 384>}, {transform_indices = @transform_6, window_bounds = array<i64: 1, 1, 384>}, {transform_indices = @transform_7, window_bounds = array<i64: 1, 128, 128>}, {transform_indices = @transform_8, window_bounds = array<i64: 1, 1, 128>}, {transform_indices = @transform_9, window_bounds = array<i64: 1, 1, 128>}, {transform_indices = @transform_10, window_bounds = array<i64: 1, 1, 128>}, {transform_indices = @transform_11, window_bounds = array<i64: 1, 128, 512>}, {transform_indices = @transform_12, window_bounds = array<i64: 1, 1, 512>}, {transform_indices = @transform_13, window_bounds = array<i64: 1, 512, 128>}, {transform_indices = @transform_14, window_bounds = array<i64: 1, 1, 128>}, {transform_indices = @transform_15, window_bounds = array<i64: 1, 1, 128>}, {transform_indices = @transform_16, window_bounds = array<i64: 1, 1, 128>}, {transform_indices = @transform_17, window_bounds = array<i64: 1, 8, 128>}, {transform_indices = @transform_18, window_bounds = array<i64: 1, 1, 128>}]} {
    %c0_i32 = arith.constant 0 : i32
    %0 = arith.cmpi eq, %arg1, %c0_i32 : i32
    %1 = arith.extui %0 : i1 to i32
    %c0_i32_0 = arith.constant 0 : i32
    %2 = arith.cmpi ne, %1, %c0_i32_0 : i32
    scf.if %2 {
      %c0_75 = arith.constant 0 : index
      %c0_76 = arith.constant 0 : index
      %c0_77 = arith.constant 0 : index
      %155 = vector.load %arg2[%c0_75, %c0_76, %c0_77] : memref<1x8x128xf32, #tpu.memory_space<vmem>>, vector<1x8x128xf32>
      %156 = vector.shape_cast %155 : vector<1x8x128xf32> to vector<8x128xf32>
      %c0_78 = arith.constant 0 : index
      %c0_79 = arith.constant 0 : index
      %157 = vector.load %arg5[%c0_78, %c0_79] : memref<1x128xf32, #tpu.memory_space<vmem>>, vector<1x128xf32>
      %c0_80 = arith.constant 0 : index
      %c0_81 = arith.constant 0 : index
      %158 = vector.load %arg6[%c0_80, %c0_81] : memref<1x128xf32, #tpu.memory_space<vmem>>, vector<1x128xf32>
      %cst_82 = arith.constant dense<0.000000e+00> : vector<8xf32>
      %159 = vector.multi_reduction <add>, %156, %cst_82 [1] : vector<8x128xf32> to vector<8xf32>
      %160 = vector.shape_cast %159 : vector<8xf32> to vector<8x1xf32>
      %cst_83 = arith.constant 1.280000e+02 : f32
      %161 = vector.broadcast %cst_83 : f32 to vector<8x1xf32>
      %162 = arith.divf %160, %161 : vector<8x1xf32>
      %163 = vector.broadcast %162 : vector<8x1xf32> to vector<8x128xf32>
      %164 = arith.subf %156, %163 : vector<8x128xf32>
      %165 = arith.mulf %164, %164 : vector<8x128xf32>
      %cst_84 = arith.constant dense<0.000000e+00> : vector<8xf32>
      %166 = vector.multi_reduction <add>, %165, %cst_84 [1] : vector<8x128xf32> to vector<8xf32>
      %167 = vector.shape_cast %166 : vector<8xf32> to vector<8x1xf32>
      %cst_85 = arith.constant 1.280000e+02 : f32
      %168 = vector.broadcast %cst_85 : f32 to vector<8x1xf32>
      %169 = arith.divf %167, %168 : vector<8x1xf32>
      %170 = vector.broadcast %162 : vector<8x1xf32> to vector<8x128xf32>
      %171 = arith.subf %156, %170 : vector<8x128xf32>
      %cst_86 = arith.constant 9.99999996E-13 : f32
      %172 = vector.broadcast %cst_86 : f32 to vector<8x1xf32>
      %173 = arith.addf %169, %172 : vector<8x1xf32>
      %174 = math.rsqrt %173 : vector<8x1xf32>
      %175 = vector.broadcast %174 : vector<8x1xf32> to vector<8x128xf32>
      %176 = arith.mulf %171, %175 : vector<8x128xf32>
      %177 = vector.broadcast %157 : vector<1x128xf32> to vector<8x128xf32>
      %178 = arith.mulf %176, %177 : vector<8x128xf32>
      %179 = vector.broadcast %158 : vector<1x128xf32> to vector<8x128xf32>
      %180 = arith.addf %178, %179 : vector<8x128xf32>
      %c0_87 = arith.constant 0 : index
      %c0_88 = arith.constant 0 : index
      %c0_89 = arith.constant 0 : index
      %181 = vector.load %arg19[%c0_87, %c0_88, %c0_89] : memref<1x8x128xf32, #tpu.memory_space<vmem>>, vector<1x8x128xf32>
      %182 = vector.shape_cast %181 : vector<1x8x128xf32> to vector<8x128xf32>
      %183 = vector.shape_cast %180 : vector<8x128xf32> to vector<1x8x128xf32>
      tpu.vector_store %arg19[%c0_87, %c0_88, %c0_89], %183 {strides = array<i32>} : memref<1x8x128xf32, #tpu.memory_space<vmem>>, vector<1x8x128xf32>,
    } else {
    }
    %c0 = arith.constant 0 : index
    %c0_1 = arith.constant 0 : index
    %c0_2 = arith.constant 0 : index
    %3 = vector.load %arg19[%c0, %c0_1, %c0_2] : memref<1x8x128xf32, #tpu.memory_space<vmem>>, vector<1x8x128xf32>
    %4 = vector.shape_cast %3 : vector<1x8x128xf32> to vector<8x128xf32>
    %5 = arith.truncf %4 : vector<8x128xf32> to vector<8x128xbf16>
    %c0_3 = arith.constant 0 : index
    %c0_4 = arith.constant 0 : index
    %c0_5 = arith.constant 0 : index
    %6 = vector.load %arg7[%c0_3, %c0_4, %c0_5] : memref<1x128x384xbf16, #tpu.memory_space<vmem>>, vector<1x128x384xbf16>
    %7 = vector.shape_cast %6 : vector<1x128x384xbf16> to vector<128x384xbf16>
    %cst = arith.constant dense<0.000000e+00> : vector<8x384xf32>
    %8 = tpu.matmul %5, %7, %cst {dimension_numbers = #tpu.dot_dimension_numbers<[1], [0], [0], [1], [0, 0, 1, 1], [], []>} : vector<8x128xbf16>, vector<128x384xbf16>, vector<8x384xf32> -> vector<8x384xf32>
    %c0_6 = arith.constant 0 : index
    %c0_7 = arith.constant 0 : index
    %c0_8 = arith.constant 0 : index
    %9 = vector.load %arg8[%c0_6, %c0_7, %c0_8] : memref<1x1x384xf32, #tpu.memory_space<vmem>>, vector<1x1x384xf32>
    %10 = vector.shape_cast %9 : vector<1x1x384xf32> to vector<1x384xf32>
    %11 = vector.broadcast %10 : vector<1x384xf32> to vector<8x384xf32>
    %12 = arith.addf %8, %11 : vector<8x384xf32>
    %c0_9 = arith.constant 0 : index
    %c0_10 = arith.constant 0 : index
    %c0_11 = arith.constant 0 : index
    %13 = vector.load %arg3[%c0_9, %c0_10, %c0_11] : memref<1x1x8xf32, #tpu.memory_space<vmem>>, vector<1x1x8xf32>
    %14 = vector.shape_cast %13 : vector<1x1x8xf32> to vector<1x8xf32>
    %cst_12 = arith.constant 1.000000e+00 : f32
    %15 = vector.broadcast %cst_12 : f32 to vector<1x8xf32>
    %16 = arith.subf %14, %15 : vector<1x8xf32>
    %cst_13 = arith.constant 1.000000e+09 : f32
    %17 = vector.broadcast %cst_13 : f32 to vector<1x8xf32>
    %18 = arith.mulf %16, %17 : vector<1x8xf32>
    %19 = vector.extract_strided_slice %12 {offsets = [0, 0], sizes = [8, 64], strides = [1, 1]} : vector<8x384xf32> to vector<8x64xf32>
    %20 = vector.extract_strided_slice %12 {offsets = [0, 128], sizes = [8, 64], strides = [1, 1]} : vector<8x384xf32> to vector<8x64xf32>
    %21 = vector.extract_strided_slice %12 {offsets = [0, 256], sizes = [8, 64], strides = [1, 1]} : vector<8x384xf32> to vector<8x64xf32>
    %22 = tpu.transpose %20, [1, 0] : vector<8x64xf32> -> vector<64x8xf32>
    %cst_14 = arith.constant dense<0.000000e+00> : vector<8x8xf32>
    %23 = tpu.matmul %19, %22, %cst_14 {dimension_numbers = #tpu.dot_dimension_numbers<[1], [0], [0], [1], [0, 0, 1, 1], [], []>} : vector<8x64xf32>, vector<64x8xf32>, vector<8x8xf32> -> vector<8x8xf32>
    %cst_15 = arith.constant 1.250000e-01 : f32
    %24 = vector.broadcast %cst_15 : f32 to vector<8x8xf32>
    %25 = arith.mulf %23, %24 : vector<8x8xf32>
    %26 = vector.broadcast %18 : vector<1x8xf32> to vector<8x8xf32>
    %27 = arith.addf %25, %26 : vector<8x8xf32>
    %cst_16 = arith.constant dense<0xFF800000> : vector<8xf32>
    %28 = vector.multi_reduction <maximumf>, %27, %cst_16 [1] : vector<8x8xf32> to vector<8xf32>
    %29 = vector.shape_cast %28 : vector<8xf32> to vector<8x1xf32>
    %30 = vector.broadcast %29 : vector<8x1xf32> to vector<8x8xf32>
    %31 = arith.subf %27, %30 : vector<8x8xf32>
    %32 = math.exp %31 : vector<8x8xf32>
    %cst_17 = arith.constant dense<0.000000e+00> : vector<8xf32>
    %33 = vector.multi_reduction <add>, %32, %cst_17 [1] : vector<8x8xf32> to vector<8xf32>
    %34 = vector.shape_cast %33 : vector<8xf32> to vector<8x1xf32>
    %35 = vector.broadcast %34 : vector<8x1xf32> to vector<8x8xf32>
    %36 = arith.divf %32, %35 : vector<8x8xf32>
    %cst_18 = arith.constant dense<0.000000e+00> : vector<8x64xf32>
    %37 = tpu.matmul %36, %21, %cst_18 {dimension_numbers = #tpu.dot_dimension_numbers<[1], [0], [0], [1], [0, 0, 1, 1], [], []>} : vector<8x8xf32>, vector<8x64xf32>, vector<8x64xf32> -> vector<8x64xf32>
    %38 = vector.extract_strided_slice %12 {offsets = [0, 64], sizes = [8, 64], strides = [1, 1]} : vector<8x384xf32> to vector<8x64xf32>
    %39 = vector.extract_strided_slice %12 {offsets = [0, 192], sizes = [8, 64], strides = [1, 1]} : vector<8x384xf32> to vector<8x64xf32>
    %40 = vector.extract_strided_slice %12 {offsets = [0, 320], sizes = [8, 64], strides = [1, 1]} : vector<8x384xf32> to vector<8x64xf32>
    %41 = tpu.transpose %39, [1, 0] : vector<8x64xf32> -> vector<64x8xf32>
    %cst_19 = arith.constant dense<0.000000e+00> : vector<8x8xf32>
    %42 = tpu.matmul %38, %41, %cst_19 {dimension_numbers = #tpu.dot_dimension_numbers<[1], [0], [0], [1], [0, 0, 1, 1], [], []>} : vector<8x64xf32>, vector<64x8xf32>, vector<8x8xf32> -> vector<8x8xf32>
    %cst_20 = arith.constant 1.250000e-01 : f32
    %43 = vector.broadcast %cst_20 : f32 to vector<8x8xf32>
    %44 = arith.mulf %42, %43 : vector<8x8xf32>
    %45 = vector.broadcast %18 : vector<1x8xf32> to vector<8x8xf32>
    %46 = arith.addf %44, %45 : vector<8x8xf32>
    %cst_21 = arith.constant dense<0xFF800000> : vector<8xf32>
    %47 = vector.multi_reduction <maximumf>, %46, %cst_21 [1] : vector<8x8xf32> to vector<8xf32>
    %48 = vector.shape_cast %47 : vector<8xf32> to vector<8x1xf32>
    %49 = vector.broadcast %48 : vector<8x1xf32> to vector<8x8xf32>
    %50 = arith.subf %46, %49 : vector<8x8xf32>
    %51 = math.exp %50 : vector<8x8xf32>
    %cst_22 = arith.constant dense<0.000000e+00> : vector<8xf32>
    %52 = vector.multi_reduction <add>, %51, %cst_22 [1] : vector<8x8xf32> to vector<8xf32>
    %53 = vector.shape_cast %52 : vector<8xf32> to vector<8x1xf32>
    %54 = vector.broadcast %53 : vector<8x1xf32> to vector<8x8xf32>
    %55 = arith.divf %51, %54 : vector<8x8xf32>
    %cst_23 = arith.constant dense<0.000000e+00> : vector<8x64xf32>
    %56 = tpu.matmul %55, %40, %cst_23 {dimension_numbers = #tpu.dot_dimension_numbers<[1], [0], [0], [1], [0, 0, 1, 1], [], []>} : vector<8x8xf32>, vector<8x64xf32>, vector<8x64xf32> -> vector<8x64xf32>
    %57 = tpu.concatenate %37, %56 in 1 : vector<8x64xf32>, vector<8x64xf32> -> vector<8x128xf32>
    %58 = arith.truncf %57 : vector<8x128xf32> to vector<8x128xbf16>
    %c0_24 = arith.constant 0 : index
    %c0_25 = arith.constant 0 : index
    %c0_26 = arith.constant 0 : index
    %59 = vector.load %arg9[%c0_24, %c0_25, %c0_26] : memref<1x128x128xbf16, #tpu.memory_space<vmem>>, vector<1x128x128xbf16>
    %60 = vector.shape_cast %59 : vector<1x128x128xbf16> to vector<128x128xbf16>
    %cst_27 = arith.constant dense<0.000000e+00> : vector<8x128xf32>
    %61 = tpu.matmul %58, %60, %cst_27 {dimension_numbers = #tpu.dot_dimension_numbers<[1], [0], [0], [1], [0, 0, 1, 1], [], []>} : vector<8x128xbf16>, vector<128x128xbf16>, vector<8x128xf32> -> vector<8x128xf32>
    %c0_28 = arith.constant 0 : index
    %c0_29 = arith.constant 0 : index
    %c0_30 = arith.constant 0 : index
    %62 = vector.load %arg10[%c0_28, %c0_29, %c0_30] : memref<1x1x128xf32, #tpu.memory_space<vmem>>, vector<1x1x128xf32>
    %63 = vector.shape_cast %62 : vector<1x1x128xf32> to vector<1x128xf32>
    %64 = vector.broadcast %63 : vector<1x128xf32> to vector<8x128xf32>
    %65 = arith.addf %61, %64 : vector<8x128xf32>
    %66 = arith.addf %4, %65 : vector<8x128xf32>
    %c0_31 = arith.constant 0 : index
    %c0_32 = arith.constant 0 : index
    %c0_33 = arith.constant 0 : index
    %67 = vector.load %arg11[%c0_31, %c0_32, %c0_33] : memref<1x1x128xf32, #tpu.memory_space<vmem>>, vector<1x1x128xf32>
    %68 = vector.shape_cast %67 : vector<1x1x128xf32> to vector<1x128xf32>
    %c0_34 = arith.constant 0 : index
    %c0_35 = arith.constant 0 : index
    %c0_36 = arith.constant 0 : index
    %69 = vector.load %arg12[%c0_34, %c0_35, %c0_36] : memref<1x1x128xf32, #tpu.memory_space<vmem>>, vector<1x1x128xf32>
    %70 = vector.shape_cast %69 : vector<1x1x128xf32> to vector<1x128xf32>
    %cst_37 = arith.constant dense<0.000000e+00> : vector<8xf32>
    %71 = vector.multi_reduction <add>, %66, %cst_37 [1] : vector<8x128xf32> to vector<8xf32>
    %72 = vector.shape_cast %71 : vector<8xf32> to vector<8x1xf32>
    %cst_38 = arith.constant 1.280000e+02 : f32
    %73 = vector.broadcast %cst_38 : f32 to vector<8x1xf32>
    %74 = arith.divf %72, %73 : vector<8x1xf32>
    %75 = vector.broadcast %74 : vector<8x1xf32> to vector<8x128xf32>
    %76 = arith.subf %66, %75 : vector<8x128xf32>
    %77 = arith.mulf %76, %76 : vector<8x128xf32>
    %cst_39 = arith.constant dense<0.000000e+00> : vector<8xf32>
    %78 = vector.multi_reduction <add>, %77, %cst_39 [1] : vector<8x128xf32> to vector<8xf32>
    %79 = vector.shape_cast %78 : vector<8xf32> to vector<8x1xf32>
    %cst_40 = arith.constant 1.280000e+02 : f32
    %80 = vector.broadcast %cst_40 : f32 to vector<8x1xf32>
    %81 = arith.divf %79, %80 : vector<8x1xf32>
    %82 = vector.broadcast %74 : vector<8x1xf32> to vector<8x128xf32>
    %83 = arith.subf %66, %82 : vector<8x128xf32>
    %cst_41 = arith.constant 9.99999996E-13 : f32
    %84 = vector.broadcast %cst_41 : f32 to vector<8x1xf32>
    %85 = arith.addf %81, %84 : vector<8x1xf32>
    %86 = math.rsqrt %85 : vector<8x1xf32>
    %87 = vector.broadcast %86 : vector<8x1xf32> to vector<8x128xf32>
    %88 = arith.mulf %83, %87 : vector<8x128xf32>
    %89 = vector.broadcast %68 : vector<1x128xf32> to vector<8x128xf32>
    %90 = arith.mulf %88, %89 : vector<8x128xf32>
    %91 = vector.broadcast %70 : vector<1x128xf32> to vector<8x128xf32>
    %92 = arith.addf %90, %91 : vector<8x128xf32>
    %93 = arith.truncf %92 : vector<8x128xf32> to vector<8x128xbf16>
    %c0_42 = arith.constant 0 : index
    %c0_43 = arith.constant 0 : index
    %c0_44 = arith.constant 0 : index
    %94 = vector.load %arg13[%c0_42, %c0_43, %c0_44] : memref<1x128x512xbf16, #tpu.memory_space<vmem>>, vector<1x128x512xbf16>
    %95 = vector.shape_cast %94 : vector<1x128x512xbf16> to vector<128x512xbf16>
    %cst_45 = arith.constant dense<0.000000e+00> : vector<8x512xf32>
    %96 = tpu.matmul %93, %95, %cst_45 {dimension_numbers = #tpu.dot_dimension_numbers<[1], [0], [0], [1], [0, 0, 1, 1], [], []>} : vector<8x128xbf16>, vector<128x512xbf16>, vector<8x512xf32> -> vector<8x512xf32>
    %c0_46 = arith.constant 0 : index
    %c0_47 = arith.constant 0 : index
    %c0_48 = arith.constant 0 : index
    %97 = vector.load %arg14[%c0_46, %c0_47, %c0_48] : memref<1x1x512xf32, #tpu.memory_space<vmem>>, vector<1x1x512xf32>
    %98 = vector.shape_cast %97 : vector<1x1x512xf32> to vector<1x512xf32>
    %99 = vector.broadcast %98 : vector<1x512xf32> to vector<8x512xf32>
    %100 = arith.addf %96, %99 : vector<8x512xf32>
    %101 = arith.mulf %100, %100 : vector<8x512xf32>
    %102 = arith.mulf %100, %101 : vector<8x512xf32>
    %cst_49 = arith.constant 4.471500e-02 : f32
    %103 = vector.broadcast %cst_49 : f32 to vector<8x512xf32>
    %104 = arith.mulf %103, %102 : vector<8x512xf32>
    %105 = arith.addf %100, %104 : vector<8x512xf32>
    %cst_50 = arith.constant 0.797884583 : f32
    %106 = vector.broadcast %cst_50 : f32 to vector<8x512xf32>
    %107 = arith.mulf %106, %105 : vector<8x512xf32>
    %108 = math.tanh %107 : vector<8x512xf32>
    %cst_51 = arith.constant 1.000000e+00 : f32
    %109 = vector.broadcast %cst_51 : f32 to vector<8x512xf32>
    %110 = arith.addf %109, %108 : vector<8x512xf32>
    %cst_52 = arith.constant 5.000000e-01 : f32
    %111 = vector.broadcast %cst_52 : f32 to vector<8x512xf32>
    %112 = arith.mulf %111, %110 : vector<8x512xf32>
    %113 = arith.mulf %100, %112 : vector<8x512xf32>
    %114 = arith.truncf %113 : vector<8x512xf32> to vector<8x512xbf16>
    %c0_53 = arith.constant 0 : index
    %c0_54 = arith.constant 0 : index
    %c0_55 = arith.constant 0 : index
    %115 = vector.load %arg15[%c0_53, %c0_54, %c0_55] : memref<1x512x128xbf16, #tpu.memory_space<vmem>>, vector<1x512x128xbf16>
    %116 = vector.shape_cast %115 : vector<1x512x128xbf16> to vector<512x128xbf16>
    %cst_56 = arith.constant dense<0.000000e+00> : vector<8x128xf32>
    %117 = tpu.matmul %114, %116, %cst_56 {dimension_numbers = #tpu.dot_dimension_numbers<[1], [0], [0], [1], [0, 0, 1, 1], [], []>} : vector<8x512xbf16>, vector<512x128xbf16>, vector<8x128xf32> -> vector<8x128xf32>
    %c0_57 = arith.constant 0 : index
    %c0_58 = arith.constant 0 : index
    %c0_59 = arith.constant 0 : index
    %118 = vector.load %arg16[%c0_57, %c0_58, %c0_59] : memref<1x1x128xf32, #tpu.memory_space<vmem>>, vector<1x1x128xf32>
    %119 = vector.shape_cast %118 : vector<1x1x128xf32> to vector<1x128xf32>
    %120 = vector.broadcast %119 : vector<1x128xf32> to vector<8x128xf32>
    %121 = arith.addf %117, %120 : vector<8x128xf32>
    %122 = arith.addf %92, %121 : vector<8x128xf32>
    %c0_60 = arith.constant 0 : index
    %c0_61 = arith.constant 0 : index
    %c0_62 = arith.constant 0 : index
    %123 = vector.load %arg17[%c0_60, %c0_61, %c0_62] : memref<1x1x128xf32, #tpu.memory_space<vmem>>, vector<1x1x128xf32>
    %124 = vector.shape_cast %123 : vector<1x1x128xf32> to vector<1x128xf32>
    %c0_63 = arith.constant 0 : index
    %c0_64 = arith.constant 0 : index
    %c0_65 = arith.constant 0 : index
    %125 = vector.load %arg18[%c0_63, %c0_64, %c0_65] : memref<1x1x128xf32, #tpu.memory_space<vmem>>, vector<1x1x128xf32>
    %126 = vector.shape_cast %125 : vector<1x1x128xf32> to vector<1x128xf32>
    %cst_66 = arith.constant dense<0.000000e+00> : vector<8xf32>
    %127 = vector.multi_reduction <add>, %122, %cst_66 [1] : vector<8x128xf32> to vector<8xf32>
    %128 = vector.shape_cast %127 : vector<8xf32> to vector<8x1xf32>
    %cst_67 = arith.constant 1.280000e+02 : f32
    %129 = vector.broadcast %cst_67 : f32 to vector<8x1xf32>
    %130 = arith.divf %128, %129 : vector<8x1xf32>
    %131 = vector.broadcast %130 : vector<8x1xf32> to vector<8x128xf32>
    %132 = arith.subf %122, %131 : vector<8x128xf32>
    %133 = arith.mulf %132, %132 : vector<8x128xf32>
    %cst_68 = arith.constant dense<0.000000e+00> : vector<8xf32>
    %134 = vector.multi_reduction <add>, %133, %cst_68 [1] : vector<8x128xf32> to vector<8xf32>
    %135 = vector.shape_cast %134 : vector<8xf32> to vector<8x1xf32>
    %cst_69 = arith.constant 1.280000e+02 : f32
    %136 = vector.broadcast %cst_69 : f32 to vector<8x1xf32>
    %137 = arith.divf %135, %136 : vector<8x1xf32>
    %138 = vector.broadcast %130 : vector<8x1xf32> to vector<8x128xf32>
    %139 = arith.subf %122, %138 : vector<8x128xf32>
    %cst_70 = arith.constant 9.99999996E-13 : f32
    %140 = vector.broadcast %cst_70 : f32 to vector<8x1xf32>
    %141 = arith.addf %137, %140 : vector<8x1xf32>
    %142 = math.rsqrt %141 : vector<8x1xf32>
    %143 = vector.broadcast %142 : vector<8x1xf32> to vector<8x128xf32>
    %144 = arith.mulf %139, %143 : vector<8x128xf32>
    %145 = vector.broadcast %124 : vector<1x128xf32> to vector<8x128xf32>
    %146 = arith.mulf %144, %145 : vector<8x128xf32>
    %147 = vector.broadcast %126 : vector<1x128xf32> to vector<8x128xf32>
    %148 = arith.addf %146, %147 : vector<8x128xf32>
    %c0_71 = arith.constant 0 : index
    %c0_72 = arith.constant 0 : index
    %c0_73 = arith.constant 0 : index
    %149 = vector.load %arg19[%c0_71, %c0_72, %c0_73] : memref<1x8x128xf32, #tpu.memory_space<vmem>>, vector<1x8x128xf32>
    %150 = vector.shape_cast %149 : vector<1x8x128xf32> to vector<8x128xf32>
    %151 = vector.shape_cast %148 : vector<8x128xf32> to vector<1x8x128xf32>
    tpu.vector_store %arg19[%c0_71, %c0_72, %c0_73], %151 {strides = array<i32>} : memref<1x8x128xf32, #tpu.memory_space<vmem>>, vector<1x8x128xf32>,
    %c1_i32 = arith.constant 1 : i32
    %152 = arith.cmpi eq, %arg1, %c1_i32 : i32
    %153 = arith.extui %152 : i1 to i32
    %c0_i32_74 = arith.constant 0 : i32
    %154 = arith.cmpi ne, %153, %c0_i32_74 : i32
    scf.if %154 {
      %c0_75 = arith.constant 0 : index
      %c0_76 = arith.constant 0 : index
      %c0_77 = arith.constant 0 : index
      %155 = vector.load %arg4[%c0_75, %c0_76, %c0_77] : memref<1x1x8xf32, #tpu.memory_space<vmem>>, vector<1x1x8xf32>
      %156 = vector.shape_cast %155 : vector<1x1x8xf32> to vector<1x8xf32>
      %cst_78 = arith.constant dense<0.000000e+00> : vector<1x128xf32>
      %157 = tpu.matmul %156, %148, %cst_78 {dimension_numbers = #tpu.dot_dimension_numbers<[1], [0], [0], [1], [0, 0, 1, 1], [], []>} : vector<1x8xf32>, vector<8x128xf32>, vector<1x128xf32> -> vector<1x128xf32>
      %c0_79 = arith.constant 0 : index
      %c0_80 = arith.constant 0 : index
      %c0_81 = arith.constant 0 : index
      %158 = vector.load %arg20[%c0_79, %c0_80, %c0_81] : memref<1x1x128xf32, #tpu.memory_space<vmem>>, vector<1x1x128xf32>
      %159 = vector.shape_cast %158 : vector<1x1x128xf32> to vector<1x128xf32>
      %160 = vector.shape_cast %157 : vector<1x128xf32> to vector<1x1x128xf32>
      tpu.vector_store %arg20[%c0_79, %c0_80, %c0_81], %160 {strides = array<i32>} : memref<1x1x128xf32, #tpu.memory_space<vmem>>, vector<1x1x128xf32>,
    } else {
    }
    return
  }
  func.func @transform_0(%arg0: i32, %arg1: i32) -> (i32, i32, i32) {
    %c0_i32 = arith.constant 0 : i32
    %c0_i32_0 = arith.constant 0 : i32
    %c0_i32_1 = arith.constant 0 : i32
    return %arg0, %c0_i32, %c0_i32_0 : i32, i32, i32
  }
  func.func @transform_1(%arg0: i32, %arg1: i32) -> (i32, i32, i32) {
    %c0_i32 = arith.constant 0 : i32
    %c0_i32_0 = arith.constant 0 : i32
    %c0_i32_1 = arith.constant 0 : i32
    return %arg0, %c0_i32, %c0_i32_0 : i32, i32, i32
  }
  func.func @transform_2(%arg0: i32, %arg1: i32) -> (i32, i32, i32) {
    %c0_i32 = arith.constant 0 : i32
    %c0_i32_0 = arith.constant 0 : i32
    %c0_i32_1 = arith.constant 0 : i32
    return %arg0, %c0_i32, %c0_i32_0 : i32, i32, i32
  }
  func.func @transform_3(%arg0: i32, %arg1: i32) -> (i32, i32) {
    %c0_i32 = arith.constant 0 : i32
    %c0_i32_0 = arith.constant 0 : i32
    %c0_i32_1 = arith.constant 0 : i32
    return %c0_i32, %c0_i32_0 : i32, i32
  }
  func.func @transform_4(%arg0: i32, %arg1: i32) -> (i32, i32) {
    %c0_i32 = arith.constant 0 : i32
    %c0_i32_0 = arith.constant 0 : i32
    %c0_i32_1 = arith.constant 0 : i32
    return %c0_i32, %c0_i32_0 : i32, i32
  }
  func.func @transform_5(%arg0: i32, %arg1: i32) -> (i32, i32, i32) {
    %c0_i32 = arith.constant 0 : i32
    %c0_i32_0 = arith.constant 0 : i32
    %c0_i32_1 = arith.constant 0 : i32
    return %arg1, %c0_i32, %c0_i32_0 : i32, i32, i32
  }
  func.func @transform_6(%arg0: i32, %arg1: i32) -> (i32, i32, i32) {
    %c0_i32 = arith.constant 0 : i32
    %c0_i32_0 = arith.constant 0 : i32
    %c0_i32_1 = arith.constant 0 : i32
    return %arg1, %c0_i32, %c0_i32_0 : i32, i32, i32
  }
  func.func @transform_7(%arg0: i32, %arg1: i32) -> (i32, i32, i32) {
    %c0_i32 = arith.constant 0 : i32
    %c0_i32_0 = arith.constant 0 : i32
    %c0_i32_1 = arith.constant 0 : i32
    return %arg1, %c0_i32, %c0_i32_0 : i32, i32, i32
  }
  func.func @transform_8(%arg0: i32, %arg1: i32) -> (i32, i32, i32) {
    %c0_i32 = arith.constant 0 : i32
    %c0_i32_0 = arith.constant 0 : i32
    %c0_i32_1 = arith.constant 0 : i32
    return %arg1, %c0_i32, %c0_i32_0 : i32, i32, i32
  }
  func.func @transform_9(%arg0: i32, %arg1: i32) -> (i32, i32, i32) {
    %c0_i32 = arith.constant 0 : i32
    %c0_i32_0 = arith.constant 0 : i32
    %c0_i32_1 = arith.constant 0 : i32
    return %arg1, %c0_i32, %c0_i32_0 : i32, i32, i32
  }
  func.func @transform_10(%arg0: i32, %arg1: i32) -> (i32, i32, i32) {
    %c0_i32 = arith.constant 0 : i32
    %c0_i32_0 = arith.constant 0 : i32
    %c0_i32_1 = arith.constant 0 : i32
    return %arg1, %c0_i32, %c0_i32_0 : i32, i32, i32
  }
  func.func @transform_11(%arg0: i32, %arg1: i32) -> (i32, i32, i32) {
    %c0_i32 = arith.constant 0 : i32
    %c0_i32_0 = arith.constant 0 : i32
    %c0_i32_1 = arith.constant 0 : i32
    return %arg1, %c0_i32, %c0_i32_0 : i32, i32, i32
  }
  func.func @transform_12(%arg0: i32, %arg1: i32) -> (i32, i32, i32) {
    %c0_i32 = arith.constant 0 : i32
    %c0_i32_0 = arith.constant 0 : i32
    %c0_i32_1 = arith.constant 0 : i32
    return %arg1, %c0_i32, %c0_i32_0 : i32, i32, i32
  }
  func.func @transform_13(%arg0: i32, %arg1: i32) -> (i32, i32, i32) {
    %c0_i32 = arith.constant 0 : i32
    %c0_i32_0 = arith.constant 0 : i32
    %c0_i32_1 = arith.constant 0 : i32
    return %arg1, %c0_i32, %c0_i32_0 : i32, i32, i32
  }
  func.func @transform_14(%arg0: i32, %arg1: i32) -> (i32, i32, i32) {
    %c0_i32 = arith.constant 0 : i32
    %c0_i32_0 = arith.constant 0 : i32
    %c0_i32_1 = arith.constant 0 : i32
    return %arg1, %c0_i32, %c0_i32_0 : i32, i32, i32
  }
  func.func @transform_15(%arg0: i32, %arg1: i32) -> (i32, i32, i32) {
    %c0_i32 = arith.constant 0 : i32
    %c0_i32_0 = arith.constant 0 : i32
    %c0_i32_1 = arith.constant 0 : i32
    return %arg1, %c0_i32, %c0_i32_0 : i32, i32, i32
  }
  func.func @transform_16(%arg0: i32, %arg1: i32) -> (i32, i32, i32) {
    %c0_i32 = arith.constant 0 : i32
    %c0_i32_0 = arith.constant 0 : i32
    %c0_i32_1 = arith.constant 0 : i32
    return %arg1, %c0_i32, %c0_i32_0 : i32, i32, i32
  }
  func.func @transform_17(%arg0: i32, %arg1: i32) -> (i32, i32, i32) {
    %c0_i32 = arith.constant 0 : i32
    %c0_i32_0 = arith.constant 0 : i32
    %c0_i32_1 = arith.constant 0 : i32
    return %arg0, %c0_i32, %c0_i32_0 : i32, i32, i32
  }
  func.func @transform_18(%arg0: i32, %arg1: i32) -> (i32, i32, i32) {
    %c0_i32 = arith.constant 0 : i32
    %c0_i32_0 = arith.constant 0 : i32
    %c0_i32_1 = arith.constant 0 : i32
    return %arg0, %c0_i32, %c0_i32_0 : i32, i32, i32
  }
}

</mosaic_0001>

<bundles_post_ra>
// kernel: sts_bert_forward.1
= control target key start
LH: loop header
LB: loop body
LE: loop exit
PB: predicated region body
PF: predicated region fallthrough
CT: control target
= control target key end

     0   :  { %s4303_s0 = inlined_call_operand.vmem [shape: f32[2,8,128], index: 0, kind: input, shape index: {}]   ;;  %s4304_s1 = inlined_call_operand.vmem [shape: f32[2,1,8], index: 1, kind: input, shape index: {}]   ;;  %s4305_s2 = inlined_call_operand.vmem [shape: f32[2,1,8], index: 2, kind: input, shape index: {}]   ;;  %s4306_s3 = inlined_call_operand.vmem [shape: f32[1,128], index: 3, kind: input, shape index: {}]   ;;  %s4307_s4 = inlined_call_operand.vmem [shape: f32[1,128], index: 4, kind: input, shape index: {}]   ;;  %s4308_s5 = inlined_call_operand.hbm [shape: bf16[2,128,384], index: 5, kind: input, shape index: {}]   ;;  %s4309_s6 = inlined_call_operand.vmem [shape: f32[2,1,384], index: 6, kind: input, shape index: {}]   ;;  %s4310_s7 = inlined_call_operand.vmem [shape: bf16[2,128,128], index: 7, kind: input, shape index: {}]   ;;  %s4311_s8 = inlined_call_operand.vmem [shape: f32[2,1,128], index: 8, kind: input, shape index: {}]   ;;  %s4312_s9 = inlined_call_operand.vmem [shape: f32[2,1,128], index: 9, kind: input, shape index: {}]   ;;  %s4313_s10 = inlined_call_operand.vmem [shape: f32[2,1,128], index: 10, kind: input, shape index: {}]   ;;  %s4314_s11 = inlined_call_operand.hbm [shape: bf16[2,128,512], index: 11, kind: input, shape index: {}]   ;;  %s4315_s12 = inlined_call_operand.vmem [shape: f32[2,1,512], index: 12, kind: input, shape index: {}]   ;;  %s4316_s13 = inlined_call_operand.hbm [shape: bf16[2,512,128], index: 13, kind: input, shape index: {}]   ;;  %s4317_s14 = inlined_call_operand.vmem [shape: f32[2,1,128], index: 14, kind: input, shape index: {}]   ;;  %s4318_s15 = inlined_call_operand.vmem [shape: f32[2,1,128], index: 15, kind: input, shape index: {}]   ;;  %s4319_s16 = inlined_call_operand.vmem [shape: f32[2,1,128], index: 16, kind: input, shape index: {}]   ;;  %s4320_s17 = inlined_call_operand.hbm [shape: f32[2,8,128], index: 17, kind: output, shape index: {0}]   ;;  %s4321_s18 = inlined_call_operand.hbm [shape: f32[2,1,128], index: 18, kind: output, shape index: {1}]  }
   0x1   :  { %4345 = sst [smem:[#allocation31_spill]] %s4303_s0 }
   0x2   :  { %4346 = sst [smem:[#allocation32_spill]] %s4304_s1 }
   0x3   :  { %4347 = sst [smem:[#allocation33_spill]] %s4305_s2 }
   0x4   :  { %4348 = sst [smem:[#allocation34_spill]] %s4306_s3 }
   0x5   :  { %4349 = sst [smem:[#allocation35_spill]] %s4307_s4 }
   0x6   :  { %4350 = sst [smem:[#allocation36_spill]] %s4308_s5 }
   0x7   :  { %4351 = sst [smem:[#allocation37_spill]] %s4309_s6 }
   0x8   :  { %4352 = sst [smem:[#allocation38_spill]] %s4310_s7 }
   0x9   :  { %4353 = sst [smem:[#allocation39_spill]] %s4311_s8 }
   0xa   :  { %4354 = sst [smem:[#allocation40_spill]] %s4312_s9 }
   0xb   :  { %4355 = sst [smem:[#allocation41_spill]] %s4313_s10 }
   0xc   :  { %4356 = sst [smem:[#allocation42_spill]] %s4314_s11 }
   0xd   :  { %4357 = sst [smem:[#allocation43_spill]] %s4315_s12 }
   0xe   :  { %4358 = sst [smem:[#allocation44_spill]] %s4316_s13 }
   0xf   :  { %4359 = sst [smem:[#allocation45_spill]] %s4317_s14 }
  0x10   :  { %4360 = sst [smem:[#allocation46_spill]] %s4318_s15 }
  0x11   :  { %4361 = sst [smem:[#allocation47_spill]] %s4319_s16 }
  0x12   :  { %4362 = sst [smem:[#allocation48_spill]] %s4320_s17 }
  0x13   :  { %4363 = sst [smem:[#allocation49_spill]] %s4321_s18 }
  0x14   :  { %24 = vsyncpa [#allocation3], 0 }
  0x15   :  { %26 = vsyncpa [#allocation3 + $0x1], 0 }
  0x16   :  { %27 = vsyncpa [#allocation6], 0 }
  0x17   :  { %29 = vsyncpa [#allocation6 + $0x1], 0 }
  0x18   :  { %30 = vsyncpa [#allocation4], 0 }
  0x19   :  { %32 = vsyncpa [#allocation4 + $0x1], 0 }
  0x1a   :  { %33 = vsyncpa [#allocation10], 0 }
  0x1b   :  { %35 = vsyncpa [#allocation10 + $0x1], 0  ;;  %s3664_s27 = smov 0   ;;  %s3666_s28 = smov 0  }
  0x1c   :  { %s3668_s29 = smov 0   ;;  %s3670_s30 = smov 0  }
  0x1d   :  { %s3672_s0 = smov 0   ;;  %s3674_s19 = smov 0  }
  0x1e   :  { %s3676_s1 = smov 0   ;;  %s3678_s20 = smov 0  }
  0x1f   :  { %s3680_s21 = smov 0   ;;  %s3682_s22 = smov 0  }
  0x20   :  { %s3684_s2 = smov 0  }
  0x21 LB: > { %4364 = sst [smem:[#allocation15_spill]] %s3510_s27  ;;  %s3718_s23 = sadd.s32 4294967295, %s3550_s2   ;;  %s3550_s2 = sphi %s3684_s2, %s41_s2   ;;  %s3546_s22 = sphi %s3682_s22, %s4440_s22   ;;  %s3542_s21 = sphi %s3680_s21, %s4439_s21   ;;  %s3538_s20 = sphi %s3678_s20, %s4438_s20   ;;  %s3534_s1 = sphi %s3676_s1, %s4437_s1   ;;  %s3530_s19 = sphi %s3674_s19, %s4436_s19   ;;  %s3526_s0 = sphi %s3672_s0, %s4435_s0   ;;  %s3522_s30 = sphi %s3670_s30, %s4434_s30   ;;  %s3518_s29 = sphi %s3668_s29, %s4433_s29   ;;  %s3514_s28 = sphi %s3666_s28, %s4432_s28   ;;  %s3510_s27 = sphi %s3664_s27, %s4431_s27  }
  0x22   : > { %4365 = sst [smem:[#allocation16_spill]] %s3514_s28  ;;  %s2750_s24 = sadd.s32 4294967294, %s3550_s2  }
  0x23   : > { %4366 = sst [smem:[#allocation17_spill]] %s3518_s29  ;;  %s50_s25 = sadd.s32 1, %s3542_s21 }
  0x24   : > { %4367 = sst [smem:[#allocation18_spill]] %s3526_s0  ;;  %s53_s26 = sadd.s32 1, %s3546_s22 }
  0x25   : > { %4368 = sst [smem:[#allocation19_spill]] %s3530_s19  ;;  %p51_p0 = scmp.ge.s32.totalorder %s50_s25, 2 }
  0x26   : > { %4369 = sst [smem:[#allocation20_spill]] %s3538_s20  ;;  %s180_s18 = sadd.s32 1, %s3530_s19 }
  0x27   : > { %4370 = sst [smem:[#allocation21_spill]] %s3542_s21  ;;  %p187_p1 = scmp.ne.s32.totalorder %s3530_s19, %s3526_s0 }
  0x28   : > { %4371 = sst [smem:[#allocation22_spill]] %s3546_s22  ;;  %p188_p2 = scmp.eq.s32.totalorder %s3550_s2, 0 }
  0x29   : > { %4372 = sst [smem:[#allocation23_spill]] %s3550_s2  ;;  %s4442_s25 = smov (%p51_p0, %s50_s25), 0 }
  0x2a   : > { %4373 = sst [smem:[#allocation24_spill]] %s4442_s25  ;;  %s4444_s26 = smov (!%p51_p0, %s53_s26), %s3546_s22 }
  0x2b   : > { %s177_s17 = ssub.s32 %s3542_s21, %s4442_s25  ;;  %p3732_p3 = por %p188_p2, %p187_p1 }
  0x2c   : > { %p55_p4 = scmp.ge.s32.totalorder %s4444_s26, 2  ;;  %p178_p5 = scmp.eq.s32.totalorder %s177_s17, 0 }
  0x2d   : > { %p193_p6 = scmp.ne.s32.totalorder %s3526_s0, %s3522_s30  ;;  %p194_p7 = scmp.eq.s32.totalorder %s3718_s23, 0 }
  0x2e   : > { %s4446_s26 = smov (%p55_p4, %s4444_s26), 0  ;;  %s492_s15 = sadd.s32 1, %s3518_s29 }
  0x2f   : > { %4375 = sst [smem:[#allocation25_spill]] %s4446_s26  ;;  %p3743_p8 = por %p194_p7, %p193_p6 }
  0x30   : > { %s3741_s3 = scalar_select %p178_p5, %s3530_s19, %s180_s18  }
  0x31   : > { %s4377_s25 = scalar_select %p3743_p8, 1, 0 }
  0x32   : > { %4376 = sst [smem:[#allocation26_spill]] %s3741_s3  ;;  %s489_s16 = ssub.s32 %s3546_s22, %s4446_s26 }
  0x33   : > { %p490_p9 = scmp.eq.s32.totalorder %s489_s16, 0  ;;  %p502_p10 = scmp.ne.s32.totalorder %s3518_s29, %s3514_s28 }
  0x34   : > { %p503_p11 = scmp.eq.s32.totalorder %s3718_s23, 3  ;;  %p508_p13 = scmp.ne.s32.totalorder %s3514_s28, %s3510_s27 }
  0x35   : > { %s3754_s17 = scalar_select %p490_p9, %s3518_s29, %s492_s15  }
  0x36   : > { %p3756_p12 = por %p503_p11, %p502_p10  ;;  %p509_p0 = scmp.eq.s32.totalorder %s2750_s24, 3 }
  0x37   : > { %4378 = sst [smem:[#allocation27_spill]] %s3754_s17  ;;  %p3058_p1 = scmp.lt.s32.totalorder %s3550_s2, 4 }
  0x38   : > { %s4379_s30 = scalar_select %p3756_p12, 1, 0 }
  0x39   : > { %s3764_s18 = sand.u32 1, %s3530_s19   ;;  %p3766_p2 = por %p509_p0, %p508_p13 }
  0x3a   : > { %4380 = sst [smem:[#allocation28_spill]] %s4379_s30  ;;  %s634_s16 = sand.u32 1, %s3550_s2  }
  0x3b   : > { %s4381_s26 = scalar_select %p3766_p2, 1, 0 }
  0x3c   : > { %p3773_p4 = pnand %p3058_p1, %p3732_p3  ;;  %s4333_s22 = sshll.u32 %s3764_s18, 8 }
  0x3d   : > { %4382 = sst [smem:[#allocation29_spill]] %s4381_s26  ;;  %s4334_s3 = sshll.u32 %s3542_s21, 12 }
  0x3e   : > { %s4384_s11 = sld [smem:[#allocation42_spill]]  ;;  %s638_s29 = scalar_lea.vmem [#allocation5], %s4333_s22 }
  0x3f   : > { %s645_s4 = sshll.u32 %s638_s29, 4  ;;  %s3790_s26 = scalar_lea.sflag [#allocation6], %s634_s16  ;;  %s3788_s4 = int_to_ptr.vmem [resolvable:$true] %s645_s4 }
  0x40   : > { %p3796_p5 = pneg %p3773_p4 }
  0x44   : > { %s3784_s19 = scalar_lea.hbm %s4384_s11, %s4334_s3  ;;  %s3307_s22 = scalar_lea.hbm %s4384_s11, 8192 }
  0x45   : > { %s3302_s27 = scalar_lea.hbm %s3784_s19, 4096  ;;  %p3308_p9 = scmp.lt.u32.totalorder %s3784_s19, %s4384_s11 }
  0x46   : > { %p3303_p3 = scmp.ne.s32.totalorder %s3784_s19, %s3302_s27  ;;  %p3309_p10 = scmp.lt.u32.totalorder %s3307_s22, %s3302_s27 }
  0x47   : > { %p3311_p13 = scmp.lt.u32.totalorder %s3302_s27, %s3784_s19 }
  0x48   : > { %p3305_p6 = pnand %p3796_p5, %p3303_p3  ;;  %p3310_p11 = por %p3309_p10, %p3308_p9 }
  0x4a   : > { %p3306_p7 = pneg %p3305_p6  ;;  %p3312_p0 = por %p3311_p13, %p3310_p11 }
  0x4c   : > { %p3313_p1 = pnand %p3312_p0, %p3306_p7 }
  0x4e   : > { %3316 = shalt.err (!%p3313_p1)
}
  0x4f   : > { %s3317_s16 = scalar_lea.vmem %s3788_s4, 4096  ;;  %s3552_s17 = smov [#allocation5]  }
  0x50   : > { %p3318_p3 = scmp.ne.s32.totalorder %s3788_s4, %s3317_s16  ;;  %s3322_s24 = sshll.u32 %s3552_s17, 4  ;;  %s3323_s24 = int_to_ptr.vmem [resolvable:$false] %s3322_s24 }
  0x51   : > { %s3324_s3 = scalar_lea.vmem %s3323_s24, 8192  ;;  %p3325_p12 = scmp.lt.s32.totalorder %s3788_s4, %s3323_s24 }
  0x52   : > { %p3320_p6 = pnand %p3318_p3, %p3796_p5  ;;  %p3326_p8 = scmp.lt.s32.totalorder %s3324_s3, %s3317_s16 }
  0x54   : > { %p3321_p2 = pneg %p3320_p6  ;;  %p3327_p9 = por %p3326_p8, %p3325_p12 }
  0x56   : > { %p3328_p10 = pnand %p3327_p9, %p3321_p2 }
  0x58   : > { %3331 = shalt.err (!%p3328_p10)
}
  0x59   : > { %s3553_s27 = smov 256   ;;  %s3554_s22 = smov 16  }
  0x5a   : > { %3047 = dma.hbm_to_vmem [thread:$0]  (!%p3773_p4), %s3784_s19, 4096, %s3788_s4, %s3790_s26, %s3553_s27, %s3553_s27, %s3554_s22  }
  0x5b   : > { %s4386_s29 = sshll.u32 %s3542_s21, 12  ;;  %s4387_s13 = sld [smem:[#allocation44_spill]] }
  0x5c   : > { %s4388_s3 = sshll.u32 %s3764_s18, 8  ;;  %p2760_p8 = scmp.ge.s32.totalorder %s3550_s2, 1 }
  0x5d   : > { %s666_s11 = scalar_lea.vmem [#allocation7], %s4388_s3  ;;  %p699_p12 = scmp.lt.s32.totalorder %s3550_s2, 5 }
  0x5e   : > { %s673_s14 = sshll.u32 %s666_s11, 4  ;;  %s3027_s10 = smul.u32 192, %s3764_s18  ;;  %s3829_s14 = int_to_ptr.vmem [resolvable:$true] %s673_s14 }
  0x5f   : > { %p3833_p2 = pnand %p2760_p8, %p699_p12  ;;  %s3028_s19 = smul.u32 3072, %s3542_s21 }
  0x60   : > { %s4390_s5 = sld [smem:[#allocation36_spill]]  ;;  %s584_s11 = scalar_lea.vmem [#allocation2], %s3027_s10 }
  0x61   : > { %s3825_s24 = scalar_lea.hbm %s4387_s13, %s4386_s29  ;;  %s591_s29 = sshll.u32 %s584_s11, 4  ;;  %s3844_s29 = int_to_ptr.vmem [resolvable:$true] %s591_s29 }
  0x62   : > { %s4389_s12 = scalar_select %p3833_p2, 1, 0 }
  0x63   : > { %s581_s16 = scalar_lea.sflag [#allocation3], %s3764_s18 }
  0x66   : > { %s3842_s22 = scalar_lea.hbm %s4390_s5, %s3028_s19  ;;  %s3337_s4 = scalar_lea.hbm %s4390_s5, 6144 }
  0x67   : > { %s3332_s17 = scalar_lea.hbm %s3842_s22, 3072  ;;  %p3338_p0 = scmp.lt.u32.totalorder %s3842_s22, %s4390_s5 }
  0x68   : > { %p3333_p7 = scmp.ne.s32.totalorder %s3842_s22, %s3332_s17  ;;  %p3339_p1 = scmp.lt.u32.totalorder %s3337_s4, %s3332_s17 }
  0x69   : > { %p3341_p6 = scmp.lt.u32.totalorder %s3332_s17, %s3842_s22 }
  0x6a   : > { %p3335_p11 = pnand %p3333_p7, %p3796_p5  ;;  %p3340_p3 = por %p3339_p1, %p3338_p0 }
  0x6c   : > { %p3336_p13 = pneg %p3335_p11  ;;  %p3342_p9 = por %p3341_p6, %p3340_p3 }
  0x6e   : > { %p3343_p10 = pnand %p3342_p9, %p3336_p13 }
  0x70   : > { %3346 = shalt.err (!%p3343_p10)
}
  0x71   : > { %s3347_s10 = scalar_lea.vmem %s3844_s29, 3072  ;;  %s3555_s21 = smov [#allocation2]  }
  0x72   : > { %p3348_p8 = scmp.ne.s32.totalorder %s3844_s29, %s3347_s10  ;;  %s3352_s11 = sshll.u32 %s3555_s21, 4  ;;  %s3353_s11 = int_to_ptr.vmem [resolvable:$false] %s3352_s11 }
  0x73   : > { %s3354_s3 = scalar_lea.vmem %s3353_s11, 6144  ;;  %p3355_p11 = scmp.lt.s32.totalorder %s3844_s29, %s3353_s11 }
  0x74   : > { %p3350_p12 = pnand %p3348_p8, %p3796_p5  ;;  %p3356_p2 = scmp.lt.s32.totalorder %s3354_s3, %s3347_s10 }
  0x76   : > { %p3351_p7 = pneg %p3350_p12  ;;  %p3357_p0 = por %p3356_p2, %p3355_p11 }
  0x78   : > { %p3358_p1 = pnand %p3357_p0, %p3351_p7 }
  0x7a   : > { %3361 = shalt.err (!%p3358_p1)
}
  0x7b   : > { %s3556_s17 = smov 192   ;;  %s3557_s4 = smov 12  }
  0x7c   : > { %3044 = dma.hbm_to_vmem [thread:$0]  (!%p3773_p4), %s3842_s22, 3072, %s3844_s29, %s581_s16, %s3556_s17, %s3556_s17, %s3557_s4  }
  0x7d   : > { %s3362_s19 = scalar_lea.hbm %s3825_s24, 4096  ;;  %s3367_s21 = scalar_lea.hbm %s4387_s13, 8192 }
  0x7e   : > { %p3363_p13 = scmp.ne.s32.totalorder %s3825_s24, %s3362_s19  ;;  %p3368_p6 = scmp.lt.u32.totalorder %s3825_s24, %s4387_s13 }
  0x7f   : > { %p3369_p9 = scmp.lt.u32.totalorder %s3367_s21, %s3362_s19  ;;  %p3371_p8 = scmp.lt.u32.totalorder %s3362_s19, %s3825_s24 }
  0x80   : > { %p3365_p2 = pnand %p3363_p13, %p3796_p5 }
  0x81   : > { %p3370_p10 = por %p3369_p9, %p3368_p6 }
  0x82   : > { %p3366_p3 = pneg %p3365_p2 }
  0x83   : > { %p3372_p12 = por %p3371_p8, %p3370_p10 }
  0x85   : > { %p3373_p7 = pnand %p3372_p12, %p3366_p3 }
  0x87   : > { %3376 = shalt.err (!%p3373_p7)
}
  0x88   : > { %s3377_s18 = scalar_lea.vmem %s3829_s14, 4096  ;;  %s3558_s22 = smov [#allocation7]  }
  0x89   : > { %p3378_p11 = scmp.ne.s32.totalorder %s3829_s14, %s3377_s18  ;;  %s3382_s29 = sshll.u32 %s3558_s22, 4  ;;  %s3383_s29 = int_to_ptr.vmem [resolvable:$false] %s3382_s29 }
  0x8a   : > { %s3384_s16 = scalar_lea.vmem %s3383_s29, 8192  ;;  %p3385_p13 = scmp.lt.s32.totalorder %s3829_s14, %s3383_s29 }
  0x8b   : > { %p3380_p0 = pnand %p3378_p11, %p3796_p5  ;;  %p3386_p2 = scmp.lt.s32.totalorder %s3384_s16, %s3377_s18 }
  0x8d   : > { %p3381_p1 = pneg %p3380_p0  ;;  %p3387_p6 = por %p3386_p2, %p3385_p13 }
  0x8f   : > { %p3388_p9 = pnand %p3387_p6, %p3381_p1 }
  0x91   : > { %3391 = shalt.err (!%p3388_p9)
}
  0x92   : > { %s3559_s17 = smov 64   ;;  %s3560_s4 = smov 4  }
  0x93   : > { %3050 = dma.hbm_to_vmem [thread:$0]  (!%p3773_p4), %s3825_s24, 4096, %s3829_s14, %s3790_s26, %s3559_s17, %s3559_s17, %s3560_s4  }
  0x94   : > { %p4391_p5 = scmp.ne.s32.totalorder %s4389_s12, 0 }
  0x96   : > { %703 = sbr.rel (%p4391_p5) target bundleno = 3710 (0xe7e), region = 88 }
  0x9d   : > { %s3895_s30 = sand.u32 1, %s3526_s0   ;;  %p4392_p3 = scmp.ne.s32.totalorder %s4377_s25, 0 }
  0x9e   : > { %s3029_s19 = smul.u32 192, %s3895_s30  ;;  %s706_s27 = scalar_lea.sflag [#allocation3], %s3895_s30 }
  0xa0   : > { %s3899_s10 = scalar_lea.vmem [#allocation2], %s3029_s19 }
  0xa1   : > { %3493 = dma.done.wait (%p4392_p3), %s706_s27, 3072  }
  0xa2   : > { %3495 = vsyncadd (%p4392_p3), %s706_s27, 4294964224  ;;  %s714_s12 = sand.u32 1, %s3718_s23   ;;  %s2761_s14 = sshll.u32 %s3895_s30, 8 }
  0xa3   : > { %s715_s26 = scalar_lea.sflag [#allocation6], %s714_s12  ;;  %s3907_s15 = scalar_lea.vmem [#allocation5], %s2761_s14 }
  0xa4   : > { %4393 = sst [smem:[#allocation30_spill]] %s3907_s15 }
  0xa5   : > { %3497 = dma.done.wait (%p4392_p3), %s715_s26, 8192  }
  0xa6   : > { %3499 = vsyncadd (%p4392_p3), %s715_s26, 4294959104  ;;  %s3914_s24 = sand.u32 1, %s3514_s28   ;;  %p835_p4 = scmp.lt.s32.totalorder %s3538_s20, 1 }
  0xa7   : > { %s2763_s21 = sshll.u32 %s3914_s24, 3  ;;  %p845_p10 = scmp.lt.s32.totalorder %s3534_s1, 1 }
  0xa8   : > { %s3920_s23 = scalar_select %p835_p4, %s3538_s20, 1 }
  0xa9   : > { %s3923_s11 = scalar_select %p845_p10, %s3534_s1, 1 }
  0xaa   : > { %s2764_s25 = sshll.u32 %s3920_s23, 3  ;;  %s4395_s4 = sld [smem:[#allocation31_spill]] }
  0xab   : > { %s3030_s5 = smul.u32 3, %s3923_s11  ;;  %s2889_s13 = sshll.u32 %s3923_s11, 6 }
  0xac   : > { %s4397_s7 = sld [smem:[#allocation38_spill]]  ;;  %s4399_s6 = sld [smem:[#allocation37_spill]] }
  0xad   : > { %s4401_s12 = sld [smem:[#allocation41_spill]]  ;;  %s2767_s28 = sshll.u32 %s3923_s11, 2 }
  0xae   : > { %s4402_s29 = sld [smem:[#allocation43_spill]]  ;;  %s4403_s3 = sld [smem:[#allocation45_spill]] }
  0xaf   : > { %s3979_s19 = scalar_lea.vmem [#allocation7], %s2761_s14  ;;  %s3981_s27 = scalar_lea.vmem [#allocation8], %s2763_s21 }
  0xb0   : > { %s838_s30 = scalar_lea.vmem %s4395_s4, %s2764_s25  ;;  %s4405_s4 = sld [smem:[#allocation47_spill]] }
  0xb1   : > { %p2768_p8 = scmp.ne.s32.totalorder %s3534_s1, 0 }
  0xb2   : > { %s3942_s2 = scalar_lea.vmem %s4397_s7, %s2889_s13  ;;  %s3951_s25 = scalar_lea.vmem %s4399_s6, %s3030_s5  ;;  %v881_v0 = vld [vmem:[%s838_s30] sm:$0xff] (!%p2768_p8) }
  0xb3   : > { %s862_s26 = scalar_lea.vmem %s4401_s12, %s3923_s11  ;;  %s4404_s6 = sld [smem:[#allocation46_spill]]  ;;  %884 = vadd.xlane.f32.xlu0 (!%p2768_p8), %v881_v0 }
  0xb4   : > { %s3965_s7 = scalar_lea.vmem %s4402_s29, %s2767_s28  ;;  %s869_s18 = scalar_lea.vmem %s4403_s3, %s3923_s11 }
  0xb5   : > { %s834_s12 = scalar_lea.vmem [#allocation9], %s3914_s24  ;;  %880 = sbr.rel (%p2768_p8) target bundleno = 491 (0x1eb), region = 104 }
  0xb6   : > { %s875_s9 = scalar_lea.vmem %s4405_s4, %s3923_s11  ;;  %s4406_s21 = sld [smem:[#allocation34_spill]] (!%p2768_p8) }
  0xb7   : > { %s4407_s30 = sld [smem:[#allocation35_spill]] (!%p2768_p8) }
  0xb9   : > { %s872_s8 = scalar_lea.vmem %s4404_s6, %s3923_s11 }
  0xbc   : > { %v2769_v9 = vld [vmem:[%s4406_s21] ss:$0 sm:$0xff] }
  0xbd   : > { %v2770_v11 = vld [vmem:[%s4407_s30] ss:$0 sm:$0xff] }
 0x140   : > { %v885_v1 = vpop.xlane.xlu0 %884 }
 0x141   : > { %v887_v2 = vmul.f32 0.0078125, %v885_v1 }
 0x143   : > { %v888_v3 = vsub.f32 %v881_v0, %v887_v2 }
 0x145   : > { %v889_v4 = vmul.f32 %v888_v3, %v888_v3 }
 0x147   : > { %890 = vadd.xlane.f32.xlu0 %v889_v4 }
 0x1d4   : > { %v891_v5 = vpop.xlane.xlu0 %890 }
 0x1d5   : > { %v892_v6 = vmul.f32 0.0078125, %v891_v5 }
 0x1d7   : > { %v893_v7 = vadd.f32 1e-12, %v892_v6 }
 0x1d9   : > { %3160 = vrsqrt.f32 %v893_v7 }
 0x1e3   : > { %v3161_v8 = vpop.eup %3160 }
 0x1e4   : > { %v895_v10 = vmul.f32 %v3161_v8, %v888_v3 }
 0x1e6   : > { %v902_v12 = vmul.f32 %v2769_v9, %v895_v10 }
 0x1e8   : > { %v909_v13 = vadd.f32 %v2770_v11, %v902_v12 }
 0x1ea   : > { %910 = vst [vmem:[%s3981_s27] sm:$0xff] %v909_v13 }
 0x1eb PF: > { %v3162_v14 = vld [vmem:[%s3899_s10 + $0x4] ss:$12 sps:$4 sm:$0xff]   ;;  %v3164_v15 = vld [vmem:[%s3899_s10] ss:$12 sps:$4 sm:$0xff]   ;;  %v3561_v16 = vmov 0   ;;  %v3562_v17 = vmov 0.0   ;;  %v947_v42 = vlaneseq }
 0x1ec   : > { %1122 = vmatprep.mubr.bf16.mxu0 %v3561_v16  ;;  %2962 = vmatprep.subr.bf16.mxu1 %v3562_v17  ;;  %v3165_v18 = vld [vmem:[%s3899_s10 + $0x1c] ss:$12 sps:$4 sm:$0xff]   ;;  %vm3563_vm0 = vmmov 0   ;;  %v3167_v19 = vld [vmem:[%s3899_s10 + $0x18] ss:$12 sps:$4 sm:$0xff]   ;;  %vm1174_vm1 = vcmask 523264  }
 0x1ed   : > { %1090 = vmatprep.subr.bf16.mxu0 %v3162_v14  ;;  %2978 = vmatprep.mubr.msk.bf16.mxu1 %vm3563_vm0, %v3562_v17  ;;  %v3168_v20 = vld [vmem:[%s3899_s10 + $0x34] ss:$12 sps:$4 sm:$0xff]   ;;  %v3170_v21 = vld [vmem:[%s3899_s10 + $0x30] ss:$12 sps:$4 sm:$0xff]   ;;  %v3171_v22 = vld [vmem:[%s3899_s10 + $0x4c] ss:$12 sps:$4 sm:$0xff]  }
 0x1ee   : > { %1091 = vmatpush1.bf16.msra.mxu0 %v3164_v15  ;;  %v3173_v23 = vld [vmem:[%s3899_s10 + $0x48] ss:$12 sps:$4 sm:$0xff]   ;;  %v3174_v25 = vld [vmem:[%s3899_s10 + $0x64] ss:$12 sps:$4 sm:$0xff]   ;;  %v3187_v26 = vld [vmem:[%s3899_s10 + $0x20] ss:$12 sps:$4 sm:$0xff]  }
 0x1ef   : > { %1092 = vmatprep.subr.bf16.mxu0 %v3165_v18  ;;  %v3186_v24 = vld [vmem:[%s3899_s10 + $0x8] ss:$12 sps:$4 sm:$0xff]   ;;  %v3176_v27 = vld [vmem:[%s3899_s10 + $0x60] ss:$12 sps:$4 sm:$0xff]   ;;  %v3179_v29 = vld [vmem:[%s3899_s10 + $0x78] ss:$12 sps:$4 sm:$0xff]  }
 0x1f0   : > { %2963 = vmatpush3.bf16.msra.mxu1 %v3186_v24  ;;  %v3177_v28 = vld [vmem:[%s3899_s10 + $0x7c] ss:$12 sps:$4 sm:$0xff]   ;;  %v3188_v30 = vld [vmem:[%s3899_s10 + $0x38] ss:$12 sps:$4 sm:$0xff]   ;;  %v3180_v31 = vld [vmem:[%s3899_s10 + $0x94] ss:$12 sps:$4 sm:$0xff]  }
 0x1f1   : > { %2964 = vmatprep.subr.bf16.mxu1 %v3562_v17  ;;  %v3189_v32 = vld [vmem:[%s3899_s10 + $0x50] ss:$12 sps:$4 sm:$0xff]   ;;  %v3183_v34 = vld [vmem:[%s3899_s10 + $0xac] ss:$12 sps:$4 sm:$0xff]   ;;  %v3190_v35 = vld [vmem:[%s3899_s10 + $0x68] ss:$12 sps:$4 sm:$0xff]  }
 0x1f2   : > { %1093 = vmatpush1.bf16.msra.mxu0 %v3167_v19  ;;  %v3182_v33 = vld [vmem:[%s3899_s10 + $0x90] ss:$12 sps:$4 sm:$0xff]   ;;  %v3185_v36 = vld [vmem:[%s3899_s10 + $0xa8] ss:$12 sps:$4 sm:$0xff]   ;;  %v3191_v38 = vld [vmem:[%s3899_s10 + $0x80] ss:$12 sps:$4 sm:$0xff]  }
 0x1f3   : > { %1094 = vmatprep.subr.bf16.mxu0 %v3168_v20  ;;  %v4021_v37 = vld [vmem:[%s3981_s27] sm:$0xff]  ;;  %v3193_v41 = vld [vmem:[%s3899_s10 + $0xb0] ss:$12 sps:$4 sm:$0xff]   ;;  %v4038_v43 = vshrl.u32 %v947_v42, 7  ;;  %s4408_s28 = sld [smem:[#allocation32_spill]]  ;;  %vm1259_vm2 = vcmask 64512  }
 0x1f4   : > { %2965 = vmatpush3.bf16.msra.mxu1 %v3187_v26  ;;  %v912_v39 = vpack.c.bf16 %v4021_v37, %v4021_v37  ;;  %v3192_v40 = vld [vmem:[%s3899_s10 + $0x98] ss:$12 sps:$4 sm:$0xff]   ;;  %v945_v45 = vld [vmem:[%s3951_s25] sm:$0x7]  ;;  %s3564_s10 = smov 64   ;;  %v3200_v42 = vld [vmem:[%s3942_s2 + $0x30] sm:$0xff]  }
 0x1f5   : > { %2966 = vmatprep.subr.bf16.mxu1 %v3562_v17  ;;  %v953_v44 = vsub.s32 1, %v4038_v43  ;;  %v4043_v46 = vsub.s32 0, %v4038_v43  ;;  %v957_v54 = vsub.s32 2, %v4038_v43  ;;  %s4410_s0 = sld [smem:[#allocation30_spill]]  ;;  %s4411_s15 = sld [smem:[#allocation39_spill]] }
 0x1f6   : > { %1095 = vmatpush1.bf16.msra.mxu0 %v3170_v21  ;;  %s4413_s17 = sld [smem:[#allocation40_spill]]  ;;  %p2880_p12 = scmp.ne.s32.totalorder %s3534_s1, 1 }
 0x1f7   : > { %1096 = vmatprep.subr.bf16.mxu0 %v3171_v22  ;;  %v954_v47 = vrot.slane %v945_v45, %v953_v44  ;;  %v950_v49 = vrot.slane %v945_v45, %v4043_v46  ;;  %v958_v56 = vrot.slane %v945_v45, %v957_v54  ;;  %v3201_v45 = vld [vmem:[%s3942_s2 + $0x38] sm:$0xff]   ;;  %vm3566_vm3 = vmmov (!%p2880_p12), 0  }
 0x1f8   : > { %2967 = vmatpush3.bf16.msra.mxu1 %v3188_v30 }
 0x1f9   : > { %2968 = vmatprep.subr.bf16.mxu1 %v3562_v17  ;;  %s4409_s13 = scalar_lea.vmem %s4408_s28, %s3920_s23 }
 0x1fa   : > { %1097 = vmatpush1.bf16.msra.mxu0 %v3173_v23  ;;  %v1171_v62 = vld [vmem:[%s4409_s13] sm:$0x1] }
 0x1fb   : > { %1098 = vmatprep.subr.bf16.mxu0 %v3174_v25  ;;  %v2795_v63 = vadd.f32 -1.0, %v1171_v62  ;;  %s4412_s5 = scalar_lea.vmem %s4411_s15, %s3923_s11  ;;  %v3210_v62 = vld [vmem:[%s4410_s0 + $0x24] ss:$16 sps:$4 sm:$0xff]  }
 0x1fc   : > { %2969 = vmatpush3.bf16.msra.mxu1 %v3189_v32  ;;  %s4414_s6 = scalar_lea.vmem %s4413_s17, %s3923_s11 }
 0x1fd   : > { %2970 = vmatprep.subr.bf16.mxu1 %v3562_v17  ;;  %v1173_v0 = vmul.f32 1e+09, %v2795_v63  ;;  %v3213_v63 = vld [vmem:[%s4410_s0 + $0x2c] ss:$16 sps:$4 sm:$0xff]  }
 0x1fe   : > { %1099 = vmatpush1.bf16.msra.mxu0 %v3176_v27 }
 0x1ff   : > { %1100 = vmatprep.subr.bf16.mxu0 %v3177_v28  ;;  %v1256_v1 = vrot.slane %v1173_v0, %v4043_v46  ;;  %v3208_v0 = vld [vmem:[%s4410_s0 + $0x20] ss:$16 sps:$4 sm:$0xff]  }
 0x200   : > { %2971 = vmatpush3.bf16.msra.mxu1 %v3190_v35  ;;  %v3194_v35 = vld [vmem:[%s3942_s2] sm:$0xff]  }
 0x201   : > { %2972 = vmatprep.subr.bf16.mxu1 %v3562_v17 }
 0x202   : > { %1101 = vmatpush1.bf16.msra.mxu0 %v3179_v29 }
 0x203   : > { %1102 = vmatprep.subr.bf16.mxu0 %v3180_v31 }
 0x204   : > { %2973 = vmatpush3.bf16.msra.mxu1 %v3191_v38  ;;  %v3196_v38 = vld [vmem:[%s3942_s2 + $0x10] sm:$0xff]  }
 0x205   : > { %2974 = vmatprep.subr.bf16.mxu1 %v3562_v17 }
 0x206   : > { %1103 = vmatpush1.bf16.msra.mxu0 %v3182_v33 }
 0x207   : > { %1104 = vmatprep.subr.bf16.mxu0 %v3183_v34 }
 0x208   : > { %2975 = vmatpush3.bf16.msra.mxu1 %v3192_v40  ;;  %v3198_v40 = vld [vmem:[%s3942_s2 + $0x20] sm:$0xff]  }
 0x209   : > { %2976 = vmatprep.subr.bf16.mxu1 %v3562_v17 }
 0x20a   : > { %1105 = vmatpush1.bf16.msra.mxu0 %v3185_v36  ;;  %v3195_v36 = vld [vmem:[%s3942_s2 + $0x8] sm:$0xff]  }
 0x20b   : > { %3002 = vmatprep.subr.bf16.mxu0 %v3562_v17 }
 0x20c   : > { %2977 = vmatpush3.bf16.msra.mxu1 %v3193_v41  ;;  %v3199_v41 = vld [vmem:[%s3942_s2 + $0x28] sm:$0xff]  }
 0x20d   : > { %1123 = vmatmul.mubr.bf16.vlgmr.msra.gmra.mrb[0].mxu0 %v912_v39  ;;  %2982 = vmatprep.subr.mxu1 %v3562_v17 }
 0x20e   : > { %3018 = vmatprep.mubr.msk.bf16.mxu0 %vm3563_vm0, %v3562_v17  ;;  %3003 = vmatpush3.bf16.msra.mxu0 %v3194_v35  ;;  %v2811_v35 = vld [vmem:[%s4414_s6] ss:$0 sm:$0xff] }
 0x20f   : > { %2979 = vmatmul.mubr.bf16.vlgmr.msra.gmra.mrb[0].mxu1 %v912_v39  ;;  %3004 = vmatprep.subr.bf16.mxu0 %v3562_v17  ;;  %v3197_v39 = vld [vmem:[%s3942_s2 + $0x18] sm:$0xff]  }
 0x210   : > { %2984 = vmatprep.mubr.msk.f32.mxu1 %vm3563_vm0, %v3562_v17 }
 0x212   : > { %3005 = vmatpush3.bf16.msra.mxu0 %v3195_v36 }
 0x213   : > { %3006 = vmatprep.subr.bf16.mxu0 %v3562_v17 }
 0x216   : > { %3007 = vmatpush3.bf16.msra.mxu0 %v3196_v38  ;;  %v2812_v38 = vld [vmem:[%s862_s26] ss:$0 sm:$0xff] }
 0x217   : > { %3008 = vmatprep.subr.bf16.mxu0 %v3562_v17 }
 0x21a   : > { %3009 = vmatpush3.bf16.msra.mxu0 %v3197_v39 }
 0x21b   : > { %3010 = vmatprep.subr.bf16.mxu0 %v3562_v17 }
 0x21e   : > { %3011 = vmatpush3.bf16.msra.mxu0 %v3198_v40 }
 0x21f   : > { %3012 = vmatprep.subr.bf16.mxu0 %v3562_v17 }
 0x222   : > { %3013 = vmatpush3.bf16.msra.mxu0 %v3199_v41 }
 0x223   : > { %3014 = vmatprep.subr.bf16.mxu0 %v3562_v17 }
 0x226   : > { %3015 = vmatpush3.bf16.msra.mxu0 %v3200_v42  ;;  %v3250_v42 = vld [vmem:[%s3979_s19 + $0x40] sm:$0xff]  }
 0x227   : > { %3016 = vmatprep.subr.bf16.mxu0 %v3562_v17 }
 0x22a   : > { %3017 = vmatpush3.bf16.msra.mxu0 %v3201_v45  ;;  %v3251_v45 = vld [vmem:[%s3979_s19 + $0xc0] sm:$0xff]  }
 0x2e0   : > { %v1124_v48 = vpop.f32.mrb[0].mxu0 }
 0x2e1   : > { %v1126_v50 = vpop.f32.mrb[1].mxu0  ;;  %v1125_v55 = vadd.f32 %v1124_v48, %v950_v49 }
 0x2e2   : > { %v1127_v51 = vadd.f32 %v1126_v50, %v954_v47  ;;  %v1128_v52 = vpop.f32.mrb[2].mxu0  ;;  %v1165_v57 = vpop.f32.mrb[0].mxu1 }
 0x2e3   : > { %v1129_v53 = vpop.f32.mrb[3].mxu0  ;;  %v1166_v58 = vadd.f32 %v1165_v57, %v958_v56  ;;  %v2980_v59 = vpop.f32.mrb[1].mxu1 }
 0x2e4   : > { %1346 = vrot.lane.b32.xlu1 %v1127_v51, %s3564_s10  ;;  %2983 = vmatpush3.xpose.msk.msra.mxu1 %vm1174_vm1, %v1127_v51  ;;  %v1168_v60 = vpop.f32.mrb[2].mxu1  ;;  %v3202_v59 = vld [vmem:[%s4410_s0] ss:$16 sps:$4 sm:$0xff]  }
 0x2e5   : > { %2987 = vmatprep.subr.mxu1 %v3562_v17  ;;  %v2981_v61 = vpop.f32.mrb[3].mxu1  ;;  %v3204_v60 = vld [vmem:[%s4410_s0 + $0x4] ss:$16 sps:$4 sm:$0xff]  }
 0x2e6   : > { %v3207_v61 = vld [vmem:[%s4410_s0 + $0xc] ss:$16 sps:$4 sm:$0xff]  }
 0x2e7   : > { %2985 = vmatmul.mubr.msk.f32.vlgmr.msra.gmra.mrb[4].mxu1 %vm1174_vm1, %v1125_v55  ;;  %1914 = vmatprep.subr.bf16.mxu0 %v3207_v61  ;;  %v3267_v61 = vld [vmem:[%s3979_s19 + $0xe0] sm:$0xff]  }
 0x2e8   : > { %1344 = vrot.lane.b32.xlu1 %v1125_v55, %s3564_s10  ;;  %2989 = vmatprep.mubr.msk.f32.mxu1 %vm3563_vm0, %v3562_v17 }
 0x2e9   : > { %2988 = vmatpush3.msra.mxu1 %v1166_v58 }
 0x2ea   : > { %2992 = vmatprep.subr.mxu1 %v3562_v17 }
 0x356   : > { %v1347_v14 = vpop.permute.xlu1 %1346 }
 0x35a   : > { %v1345_v18 = vpop.permute.xlu1 %1344 }
 0x3ba   : > { %v1247_v2 = vpop.f32.mrb[4].mxu1 }
 0x3bb   : > { %v1251_v3 = vmul.f32 0.125, %v1247_v2  ;;  %v2986_v4 = vpop.f32.mrb[5].mxu1  ;;  %v3216_v2 = vld [vmem:[%s4410_s0 + $0x44] ss:$16 sps:$4 sm:$0xff]  }
 0x3bc   : > { %v3217_v4 = vld [vmem:[%s4410_s0 + $0x48] ss:$16 sps:$4 sm:$0xff]  }
 0x3bd   : > { %v1258_v5 = vadd.f32 %v1256_v1, %v1251_v3  ;;  %v3214_v3 = vld [vmem:[%s4410_s0 + $0x40] ss:$16 sps:$4 sm:$0xff]  }
 0x3bf   : > { %v1260_v6 = vsel %vm1259_vm2, %v1258_v5, -inf }
 0x3c0   : > { %1261 = vmax.xlane.f32.xlu0 %v1260_v6 }
 0x44d   : > { %v1262_v7 = vpop.xlane.xlu0 %1261 }
 0x44e   : > { %v1263_v8 = vsub.f32 %v1258_v5, %v1262_v7 }
 0x450   : > { %v1264_v9 = vmul.f32 1.442695, %v1263_v8 }
 0x452   : > { %3282 = vpow2.f32 %v1264_v9  ;;  %v3222_v9 = vld [vmem:[%s4410_s0 + $0x64] ss:$16 sps:$4 sm:$0xff]  }
 0x45c   : > { %v3283_v10 = vpop.eup %3282 }
 0x45d   : > { %v1266_v11 = vsel %vm1259_vm2, %v3283_v10, 0.0 }
 0x45e   : > { %1267 = vadd.xlane.f32.xlu0 %v1266_v11  ;;  %v3220_v11 = vld [vmem:[%s4410_s0 + $0x60] ss:$16 sps:$4 sm:$0xff]  }
 0x4eb   : > { %v1268_v12 = vpop.xlane.xlu0 %1267 }
 0x4ec   : > { %3284 = vrcp.f32 %v1268_v12  ;;  %v3223_v12 = vld [vmem:[%s4410_s0 + $0x68] ss:$16 sps:$4 sm:$0xff]  }
 0x4f6   : > { %v3285_v13 = vpop.eup %3284 }
 0x4f7   : > { %v1270_v15 = vmul.f32 %v3285_v13, %v3283_v10  ;;  %v3225_v10 = vld [vmem:[%s4410_s0 + $0x6c] ss:$16 sps:$4 sm:$0xff]   ;;  %v3228_v13 = vld [vmem:[%s4410_s0 + $0x84] ss:$16 sps:$4 sm:$0xff]  }
 0x4f9   : > { %2990 = vmatmul.mubr.msk.f32.vlgmr.msra.gmra.mrb[6].mxu1 %vm1259_vm2, %v1270_v15  ;;  %v3226_v15 = vld [vmem:[%s4410_s0 + $0x80] ss:$16 sps:$4 sm:$0xff]  }
 0x4fa   : > { %2993 = vmatpush3.xpose.msk.msra.mxu1 %vm1174_vm1, %v1347_v14  ;;  %2994 = vmatprep.mubr.msk.f32.mxu1 %vm3563_vm0, %v3562_v17  ;;  %v3231_v14 = vld [vmem:[%s4410_s0 + $0x8c] ss:$16 sps:$4 sm:$0xff]  }
 0x4fb   : > { %2997 = vmatprep.subr.mxu1 %v3562_v17 }
 0x4fd   : > { %2995 = vmatmul.mubr.msk.f32.vlgmr.msra.gmra.mrb[8].mxu1 %vm1174_vm1, %v1345_v18  ;;  %v3229_v18 = vld [vmem:[%s4410_s0 + $0x88] ss:$16 sps:$4 sm:$0xff]  }
 0x4fe   : > { %2999 = vmatprep.mubr.msk.f32.mxu1 %vm3563_vm0, %v3562_v17  ;;  %v2802_v17 = vld [vmem:[%s4412_s5] ss:$0 sm:$0xff] }
 0x5cc   : > { %v1340_v19 = vpop.f32.mrb[6].mxu1 }
 0x5cd   : > { %v2991_v20 = vpop.f32.mrb[7].mxu1 }
 0x5ce   : > { %v3237_v20 = vld [vmem:[%s4410_s0 + $0xac] ss:$16 sps:$4 sm:$0xff]  }
 0x5d0   : > { %v1418_v21 = vpop.f32.mrb[8].mxu1 }
 0x5d1   : > { %v1422_v22 = vmul.f32 0.125, %v1418_v21  ;;  %v2996_v23 = vpop.f32.mrb[9].mxu1  ;;  %v3232_v21 = vld [vmem:[%s4410_s0 + $0xa0] ss:$16 sps:$4 sm:$0xff]  }
 0x5d2   : > { %v3240_v23 = vld [vmem:[%s4410_s0 + $0xc4] ss:$16 sps:$4 sm:$0xff]  }
 0x5d3   : > { %v1423_v24 = vadd.f32 %v1422_v22, %v1256_v1  ;;  %v3211_v1 = vld [vmem:[%s4410_s0 + $0x28] ss:$16 sps:$4 sm:$0xff]  }
 0x5d4   : > { %v3235_v22 = vld [vmem:[%s4410_s0 + $0xa8] ss:$16 sps:$4 sm:$0xff]  }
 0x5d5   : > { %v1424_v25 = vsel %vm1259_vm2, %v1423_v24, -inf }
 0x5d6   : > { %1425 = vmax.xlane.f32.xlu0 %v1424_v25  ;;  %v3238_v25 = vld [vmem:[%s4410_s0 + $0xc0] ss:$16 sps:$4 sm:$0xff]  }
 0x5ec   : > { %1436 = vrot.lane.b32.xlu0 %v1166_v58, %s3564_s10 }
 0x663   : > { %v1426_v26 = vpop.xlane.xlu0 %1425 }
 0x664   : > { %v1427_v27 = vsub.f32 %v1423_v24, %v1426_v26  ;;  %v3243_v24 = vld [vmem:[%s4410_s0 + $0xcc] ss:$16 sps:$4 sm:$0xff]   ;;  %v3241_v26 = vld [vmem:[%s4410_s0 + $0xc8] ss:$16 sps:$4 sm:$0xff]  }
 0x666   : > { %v1428_v28 = vmul.f32 1.442695, %v1427_v27  ;;  %v3246_v27 = vld [vmem:[%s4410_s0 + $0xe4] ss:$16 sps:$4 sm:$0xff]  }
 0x667   : > { %v1437_v29 = vpop.permute.xlu0 %1436 }
 0x668   : > { %3286 = vpow2.f32 %v1428_v28  ;;  %2998 = vmatpush3.msra.mxu1 %v1437_v29  ;;  %v3249_v28 = vld [vmem:[%s4410_s0 + $0xec] ss:$16 sps:$4 sm:$0xff]   ;;  %v3244_v29 = vld [vmem:[%s4410_s0 + $0xe0] ss:$16 sps:$4 sm:$0xff]  }
 0x669   : > { %1873 = vmatprep.subr.bf16.mxu1 %v3204_v60  ;;  %v3265_v60 = vld [vmem:[%s3979_s19 + $0x98] sm:$0xff]  }
 0x672   : > { %v3287_v30 = vpop.eup %3286 }
 0x673   : > { %v1430_v31 = vsel %vm1259_vm2, %v3287_v30, 0.0 }
 0x674   : > { %1431 = vadd.xlane.f32.xlu1 %v1430_v31 }
 0x701   : > { %v1432_v32 = vpop.xlane.xlu1 %1431 }
 0x702   : > { %3288 = vrcp.f32 %v1432_v32 }
 0x70c   : > { %v3289_v33 = vpop.eup %3288 }
 0x70d   : > { %v1434_v34 = vmul.f32 %v3289_v33, %v3287_v30  ;;  %v3247_v30 = vld [vmem:[%s4410_s0 + $0xe8] ss:$16 sps:$4 sm:$0xff]  }
 0x70f   : > { %3000 = vmatmul.mubr.msk.f32.vlgmr.msra.gmra.mrb[10].mxu1 %vm1259_vm2, %v1434_v34 }
 0x710   : > { %1905 = vmatprep.mubr.bf16.mxu1 %v3561_v16  ;;  %1874 = vmatpush1.bf16.msra.mxu1 %v3202_v59  ;;  %v3264_v59 = vld [vmem:[%s3979_s19 + $0x18] sm:$0xff]  }
 0x711   : > { %1875 = vmatprep.subr.bf16.mxu1 %v3210_v62  ;;  %v3268_v62 = vld [vmem:[%s3979_s19 + $0x20] sm:$0xff]  }
 0x714   : > { %1876 = vmatpush1.bf16.msra.mxu1 %v3208_v0  ;;  %v3270_v0 = vld [vmem:[%s3979_s19 + $0x68] sm:$0xff]  }
 0x715   : > { %1877 = vmatprep.subr.bf16.mxu1 %v3216_v2  ;;  %v3272_v2 = vld [vmem:[%s3979_s19 + $0x28] sm:$0xff]  }
 0x718   : > { %1878 = vmatpush1.bf16.msra.mxu1 %v3214_v3  ;;  %v3274_v3 = vld [vmem:[%s3979_s19 + $0x70] sm:$0xff]  }
 0x719   : > { %1879 = vmatprep.subr.bf16.mxu1 %v3222_v9  ;;  %v3280_v9 = vld [vmem:[%s3979_s19 + $0x38] sm:$0xff]  }
 0x71c   : > { %1880 = vmatpush1.bf16.msra.mxu1 %v3220_v11  ;;  %v1691_v11 = vld [vmem:[%s3965_s7] sm:$0xf] }
 0x71d   : > { %1881 = vmatprep.subr.bf16.mxu1 %v3228_v13  ;;  %v1696_v13 = vrot.slane %v1691_v11, %v4043_v46 }
 0x720   : > { %1882 = vmatpush1.bf16.msra.mxu1 %v3226_v15  ;;  %v1700_v15 = vrot.slane %v1691_v11, %v953_v44 }
 0x7e2   : > { %v1508_v47 = vpop.f32.mrb[10].mxu1 }
 0x7e3   : > { %1513 = vrot.lane.b32.xlu0 %v1508_v47, %s3564_s10  ;;  %v3001_v48 = vpop.f32.mrb[11].mxu1  ;;  %v3252_v47 = vld [vmem:[%s3979_s19] sm:$0xff]  }
 0x7e4   : > { %v3253_v48 = vld [vmem:[%s3979_s19 + $0x80] sm:$0xff]  }
 0x855   : > { %v1514_v49 = vpop.permute.xlu0 %1513 }
 0x856   : > { %v1516_v50 = vsel %vm1174_vm1, %v1340_v19, %v1514_v49  ;;  %v3234_v19 = vld [vmem:[%s4410_s0 + $0xa4] ss:$16 sps:$4 sm:$0xff]   ;;  %v3254_v49 = vld [vmem:[%s3979_s19 + $0x48] sm:$0xff]  }
 0x857   : > { %v1517_v51 = vpack.c.bf16 %v1516_v50, %v1516_v50  ;;  %1883 = vmatprep.subr.bf16.mxu1 %v3234_v19  ;;  %v3255_v50 = vld [vmem:[%s3979_s19 + $0xc8] sm:$0xff]  }
 0x858   : > { %1884 = vmatpush1.bf16.msra.mxu1 %v3232_v21 }
 0x859   : > { %3019 = vmatmul.mubr.bf16.vlgmr.msra.gmra.mrb[4].mxu0 %v1517_v51  ;;  %1885 = vmatprep.subr.bf16.mxu1 %v3240_v23  ;;  %v3256_v51 = vld [vmem:[%s3979_s19 + $0x8] sm:$0xff]  }
 0x85a   : > { %1946 = vmatprep.mubr.bf16.mxu0 %v3561_v16  ;;  %v3205_v16 = vld [vmem:[%s4410_s0 + $0x8] ss:$16 sps:$4 sm:$0xff]  }
 0x85b   : > { %1915 = vmatpush1.bf16.msra.mxu0 %v3205_v16  ;;  %v3266_v16 = vld [vmem:[%s3979_s19 + $0x60] sm:$0xff]  }
 0x85c   : > { %1916 = vmatprep.subr.bf16.mxu0 %v3213_v63  ;;  %1886 = vmatpush1.bf16.msra.mxu1 %v3238_v25  ;;  %v3269_v63 = vld [vmem:[%s3979_s19 + $0xa0] sm:$0xff]  }
 0x85d   : > { %1887 = vmatprep.subr.bf16.mxu1 %v3246_v27 }
 0x85f   : > { %1917 = vmatpush1.bf16.msra.mxu0 %v3211_v1  ;;  %v3271_v1 = vld [vmem:[%s3979_s19 + $0xe8] sm:$0xff]  }
 0x860   : > { %1888 = vmatpush1.bf16.msra.mxu1 %v3244_v29 }
 0x861   : > { %2916 = vmatprep.subr.bf16.mxu1 %v3250_v42 }
 0x92c   : > { %v1623_v52 = vpop.f32.mrb[4].mxu0 }
 0x92d   : > { %v1624_v53 = vadd.f32 %v2802_v17, %v1623_v52  ;;  %v3020_v55 = vpop.f32.mrb[5].mxu0  ;;  %v3257_v17 = vld [vmem:[%s3979_s19 + $0x88] sm:$0xff]   ;;  %v3258_v52 = vld [vmem:[%s3979_s19 + $0x50] sm:$0xff]  }
 0x92e   : > { %v1626_v56 = vpop.f32.mrb[6].mxu0  ;;  %v3260_v55 = vld [vmem:[%s3979_s19 + $0x10] sm:$0xff]  }
 0x92f   : > { %v3021_v57 = vpop.f32.mrb[7].mxu0  ;;  %v1629_v58 = vadd.f32 %v1624_v53, %v4021_v37  ;;  %v3219_v37 = vld [vmem:[%s4410_s0 + $0x4c] ss:$16 sps:$4 sm:$0xff]   ;;  %v3259_v53 = vld [vmem:[%s3979_s19 + $0xd0] sm:$0xff]   ;;  %s4419_s0 = sld [smem:[#allocation33_spill]] (!%p2880_p12) }
 0x930   : > { %1918 = vmatprep.subr.bf16.mxu0 %v3219_v37  ;;  %v3261_v56 = vld [vmem:[%s3979_s19 + $0x90] sm:$0xff]   ;;  %v3262_v57 = vld [vmem:[%s3979_s19 + $0x58] sm:$0xff]   ;;  %v3273_v37 = vld [vmem:[%s3979_s19 + $0xa8] sm:$0xff]  }
 0x931   : > { %1632 = vadd.xlane.f32.xlu0 %v1629_v58  ;;  %1919 = vmatpush1.bf16.msra.mxu0 %v3217_v4  ;;  %v3275_v4 = vld [vmem:[%s3979_s19 + $0xf0] sm:$0xff]  }
 0x932   : > { %1920 = vmatprep.subr.bf16.mxu0 %v3225_v10  ;;  %v3281_v10 = vld [vmem:[%s3979_s19 + $0xb8] sm:$0xff]  }
 0x935   : > { %1921 = vmatpush1.bf16.msra.mxu0 %v3223_v12  ;;  %v1707_v12 = vsub.s32 3, %v4038_v43  ;;  %s4420_s20 = scalar_lea.vmem (!%p2880_p12), %s4419_s0, %s3920_s23 }
 0x936   : > { %1922 = vmatprep.subr.bf16.mxu0 %v3231_v14  ;;  %v1704_v14 = vrot.slane %v1691_v11, %v957_v54 }
 0x939   : > { %1923 = vmatpush1.bf16.msra.mxu0 %v3229_v18  ;;  %v1708_v18 = vrot.slane %v1691_v11, %v1707_v12 }
 0x93a   : > { %1924 = vmatprep.subr.bf16.mxu0 %v3237_v20 }
 0x93d   : > { %1925 = vmatpush1.bf16.msra.mxu0 %v3235_v22 }
 0x93e   : > { %1926 = vmatprep.subr.bf16.mxu0 %v3243_v24 }
 0x941   : > { %1927 = vmatpush1.bf16.msra.mxu0 %v3241_v26 }
 0x942   : > { %1928 = vmatprep.subr.bf16.mxu0 %v3249_v28 }
 0x945   : > { %1929 = vmatpush1.bf16.msra.mxu0 %v3247_v30 }
 0x946   : > { %2938 = vmatprep.subr.bf16.mxu0 %v3251_v45 }
 0x9be   : > { %v1633_v5 = vpop.xlane.xlu0 %1632 }
 0x9bf   : > { %v1635_v6 = vmul.f32 0.0078125, %v1633_v5  ;;  %v3276_v5 = vld [vmem:[%s3979_s19 + $0x30] sm:$0xff]  }
 0x9c1   : > { %v1636_v7 = vsub.f32 %v1629_v58, %v1635_v6  ;;  %v3263_v58 = vld [vmem:[%s3979_s19 + $0xd8] sm:$0xff]   ;;  %v3277_v6 = vld [vmem:[%s3979_s19 + $0xb0] sm:$0xff]  }
 0x9c3   : > { %v1637_v8 = vmul.f32 %v1636_v7, %v1636_v7 }
 0x9c5   : > { %1638 = vadd.xlane.f32.xlu1 %v1637_v8  ;;  %v3279_v8 = vld [vmem:[%s3979_s19 + $0xf8] sm:$0xff]  }
 0xa52   : > { %v1639_v31 = vpop.xlane.xlu1 %1638 }
 0xa53   : > { %v1640_v32 = vmul.f32 0.0078125, %v1639_v31 }
 0xa55   : > { %v1641_v33 = vadd.f32 1e-12, %v1640_v32 }
 0xa57   : > { %3290 = vrsqrt.f32 %v1641_v33 }
 0xa61   : > { %v3291_v34 = vpop.eup %3290 }
 0xa62   : > { %v1643_v36 = vmul.f32 %v3291_v34, %v1636_v7  ;;  %v3278_v7 = vld [vmem:[%s3979_s19 + $0x78] sm:$0xff]  }
 0xa64   : > { %v1650_v39 = vmul.f32 %v2811_v35, %v1643_v36 }
 0xa66   : > { %v4146_v40 = vadd.f32 %v2812_v38, %v1650_v39 }
 0xa68   : > { %v1658_v41 = vpack.c.bf16 %v4146_v40, %v4146_v40 }
 0xa6a   : > { %1906 = vmatmul.mubr.bf16.vlgmr.msra.gmra.mrb[12].mxu1 %v1658_v41  ;;  %1947 = vmatmul.mubr.bf16.vlgmr.msra.gmra.mrb[8].mxu0 %v1658_v41 }
 0xa6b   : > { %2917 = vmatpush3.bf16.msra.mxu1 %v3252_v47  ;;  %2939 = vmatpush3.bf16.msra.mxu0 %v3253_v48 }
 0xa6c   : > { %2918 = vmatprep.subr.bf16.mxu1 %v3254_v49  ;;  %2940 = vmatprep.subr.bf16.mxu0 %v3255_v50 }
 0xa6f   : > { %2919 = vmatpush3.bf16.msra.mxu1 %v3256_v51  ;;  %2941 = vmatpush3.bf16.msra.mxu0 %v3257_v17 }
 0xa70   : > { %2920 = vmatprep.subr.bf16.mxu1 %v3258_v52  ;;  %2942 = vmatprep.subr.bf16.mxu0 %v3259_v53 }
 0xa73   : > { %2921 = vmatpush3.bf16.msra.mxu1 %v3260_v55  ;;  %2943 = vmatpush3.bf16.msra.mxu0 %v3261_v56 }
 0xa74   : > { %2922 = vmatprep.subr.bf16.mxu1 %v3262_v57  ;;  %2944 = vmatprep.subr.bf16.mxu0 %v3263_v58 }
 0xa77   : > { %2923 = vmatpush3.bf16.msra.mxu1 %v3264_v59  ;;  %2945 = vmatpush3.bf16.msra.mxu0 %v3265_v60 }
 0xa78   : > { %2924 = vmatprep.subr.bf16.mxu1 %v3266_v16  ;;  %2946 = vmatprep.subr.bf16.mxu0 %v3267_v61 }
 0xa7b   : > { %2925 = vmatpush3.bf16.msra.mxu1 %v3268_v62  ;;  %2947 = vmatpush3.bf16.msra.mxu0 %v3269_v63 }
 0xa7c   : > { %2926 = vmatprep.subr.bf16.mxu1 %v3270_v0  ;;  %2948 = vmatprep.subr.bf16.mxu0 %v3271_v1 }
 0xa7f   : > { %2927 = vmatpush3.bf16.msra.mxu1 %v3272_v2  ;;  %2949 = vmatpush3.bf16.msra.mxu0 %v3273_v37 }
 0xa80   : > { %2928 = vmatprep.subr.bf16.mxu1 %v3274_v3  ;;  %2950 = vmatprep.subr.bf16.mxu0 %v3275_v4 }
 0xa83   : > { %2929 = vmatpush3.bf16.msra.mxu1 %v3276_v5  ;;  %2951 = vmatpush3.bf16.msra.mxu0 %v3277_v6 }
 0xa84   : > { %2930 = vmatprep.subr.bf16.mxu1 %v3278_v7  ;;  %2952 = vmatprep.subr.bf16.mxu0 %v3279_v8  ;;  %v2845_v8 = vld [vmem:[%s869_s18] ss:$0 sm:$0xff] }
 0xa87   : > { %2931 = vmatpush3.bf16.msra.mxu1 %v3280_v9  ;;  %2953 = vmatpush3.bf16.msra.mxu0 %v3281_v10 }
 0xb3d   : > { %v1907_v19 = vpop.f32.mrb[12].mxu1  ;;  %v1948_v20 = vpop.f32.mrb[8].mxu0 }
 0xb3e   : > { %v1908_v21 = vadd.f32 %v1907_v19, %v1696_v13  ;;  %v1949_v22 = vadd.f32 %v1948_v20, %v1704_v14  ;;  %v1909_v23 = vpop.f32.mrb[13].mxu1  ;;  %v1950_v24 = vpop.f32.mrb[9].mxu0 }
 0xb3f   : > { %v1910_v25 = vadd.f32 %v1909_v23, %v1700_v15  ;;  %v1951_v26 = vadd.f32 %v1950_v24, %v1708_v18  ;;  %v1911_v27 = vpop.f32.mrb[14].mxu1  ;;  %v1952_v28 = vpop.f32.mrb[10].mxu0 }
 0xb40   : > { %v1955_v29 = vmul.f32 %v1908_v21, %v1908_v21  ;;  %v1957_v30 = vmul.f32 %v1949_v22, %v1949_v22  ;;  %v1912_v46 = vpop.f32.mrb[15].mxu1  ;;  %v1953_v31 = vpop.f32.mrb[11].mxu0 }
 0xb41   : > { %v1956_v32 = vmul.f32 %v1910_v25, %v1910_v25  ;;  %v1958_v54 = vmul.f32 %v1951_v26, %v1951_v26 }
 0xb42   : > { %v1959_v33 = vmul.f32 %v1955_v29, %v1908_v21  ;;  %v1961_v43 = vmul.f32 %v1957_v30, %v1949_v22  ;;  %v2878_v30 = vld [vmem:[%s872_s8] ss:$0 sm:$0xff] }
 0xb43   : > { %v1960_v44 = vmul.f32 %v1956_v32, %v1910_v25  ;;  %v1962_v34 = vmul.f32 %v1958_v54, %v1951_v26  ;;  %v2371_v54 = vld [vmem:[%s4420_s20] sm:$0x1] (!%p2880_p12) }
 0xb44   : > { %v1963_v35 = vmul.f32 0.044715, %v1959_v33  ;;  %v1965_v36 = vmul.f32 0.044715, %v1961_v43  ;;  %v3565_v33 = vmov (!%p2880_p12), 0.0  }
 0xb45   : > { %v1964_v38 = vmul.f32 0.044715, %v1960_v44  ;;  %v1966_v39 = vmul.f32 0.044715, %v1962_v34  ;;  %3022 = vmatprep.subr.mxu0 (!%p2880_p12), %v3565_v33 }
 0xb46   : > { %v1967_v41 = vadd.f32 %v1963_v35, %v1908_v21  ;;  %v1969_v42 = vadd.f32 %v1965_v36, %v1949_v22 }
 0xb47   : > { %v1968_v45 = vadd.f32 %v1964_v38, %v1910_v25  ;;  %v1970_v47 = vadd.f32 %v1966_v39, %v1951_v26 }
 0xb48   : > { %v1971_v48 = vmul.f32 0.7978846, %v1967_v41  ;;  %v1973_v49 = vmul.f32 0.7978846, %v1969_v42 }
 0xb49   : > { %v1972_v50 = vmul.f32 0.7978846, %v1968_v45  ;;  %v1974_v51 = vmul.f32 0.7978846, %v1970_v47 }
 0xb4a   : > { %3292 = vtanh.f32 %v1971_v48 }
 0xb4b   : > { %3294 = vtanh.f32 %v1973_v49 }
 0xb4c   : > { %3296 = vtanh.f32 %v1972_v50 }
 0xb4d   : > { %3298 = vtanh.f32 %v1974_v51 }
 0xb54   : > { %v3293_v17 = vpop.eup %3292 }
 0xb55   : > { %v3295_v52 = vpop.eup %3294  ;;  %v1979_v53 = vadd.f32 1.0, %v3293_v17 }
 0xb56   : > { %v3297_v55 = vpop.eup %3296  ;;  %v1981_v56 = vadd.f32 1.0, %v3295_v52 }
 0xb57   : > { %v3299_v57 = vpop.eup %3298  ;;  %v1980_v58 = vadd.f32 1.0, %v3297_v55  ;;  %v1983_v59 = vmul.f32 0.5, %v1979_v53 }
 0xb58   : > { %v1982_v60 = vadd.f32 1.0, %v3299_v57  ;;  %v1985_v16 = vmul.f32 0.5, %v1981_v56 }
 0xb59   : > { %v1984_v61 = vmul.f32 0.5, %v1980_v58  ;;  %v1987_v63 = vmul.f32 %v1983_v59, %v1908_v21 }
 0xb5a   : > { %v1986_v62 = vmul.f32 0.5, %v1982_v60  ;;  %v1989_v1 = vmul.f32 %v1985_v16, %v1949_v22 }
 0xb5b   : > { %v1988_v0 = vmul.f32 %v1984_v61, %v1910_v25  ;;  %v1991_v4 = vpack.c.bf16 %v1987_v63, %v1987_v63 }
 0xb5c   : > { %v1990_v2 = vmul.f32 %v1986_v62, %v1951_v26  ;;  %v1993_v5 = vpack.c.bf16 %v1989_v1, %v1989_v1 }
 0xb5d   : > { %v1992_v37 = vpack.c.bf16 %v1988_v0, %v1988_v0 }
 0xb5e   : > { %v1994_v3 = vpack.c.bf16 %v1990_v2, %v1990_v2 }
 0xb5f   : > { %2290 = vmatprep.mubr.bf16.mxu1 %v1992_v37 }
 0xb60   : > { %2330 = vmatprep.mubr.bf16.mxu0 %v1994_v3  ;;  %2291 = vmatmul.mubr.bf16.vlgmr.msra.gmra.mrb[16].mxu1 %v1991_v4 }
 0xb61   : > { %2331 = vmatmul.mubr.bf16.vlgmr.msra.gmra.mrb[12].mxu0 %v1993_v5 }
 0xb62   : > { %3024 = vmatprep.mubr.msk.f32.mxu0 (!%p2880_p12), %vm3566_vm3, %v3565_v33 }
 0xc33   : > { %v2932_v6 = vpop.f32.mrb[16].mxu1 }
 0xc34   : > { %v2954_v7 = vpop.f32.mrb[12].mxu0  ;;  %v2933_v9 = vpop.f32.mrb[17].mxu1 }
 0xc35   : > { %v2934_v10 = vadd.f32 %v2933_v9, %v2932_v6  ;;  %v2955_v11 = vpop.f32.mrb[13].mxu0  ;;  %v2935_v12 = vpop.f32.mrb[18].mxu1 }
 0xc36   : > { %v2956_v13 = vadd.f32 %v2955_v11, %v2954_v7  ;;  %v2957_v14 = vpop.f32.mrb[14].mxu0  ;;  %v2936_v15 = vpop.f32.mrb[19].mxu1 }
 0xc37   : > { %v2293_v18 = vadd.f32 %v2934_v10, %v2845_v8  ;;  %v2958_v19 = vpop.f32.mrb[15].mxu0 }
 0xc39   : > { %v2333_v20 = vadd.f32 %v2956_v13, %v2293_v18 }
 0xc3b   : > { %v2338_v21 = vadd.f32 %v2333_v20, %v4146_v40  ;;  %v2879_v40 = vld [vmem:[%s875_s9] ss:$0 sm:$0xff] }
 0xc3d   : > { %2341 = vadd.xlane.f32.xlu1 %v2338_v21 }
 0xcca   : > { %v2342_v22 = vpop.xlane.xlu1 %2341 }
 0xccb   : > { %v2343_v23 = vmul.f32 0.0078125, %v2342_v22 }
 0xccd   : > { %v2344_v24 = vsub.f32 %v2338_v21, %v2343_v23 }
 0xccf   : > { %v2345_v25 = vmul.f32 %v2344_v24, %v2344_v24 }
 0xcd1   : > { %2346 = vadd.xlane.f32.xlu1 %v2345_v25 }
 0xd5e   : > { %v2347_v26 = vpop.xlane.xlu1 %2346 }
 0xd5f   : > { %v2348_v27 = vmul.f32 0.0078125, %v2347_v26 }
 0xd61   : > { %v2349_v28 = vadd.f32 1e-12, %v2348_v27 }
 0xd63   : > { %3300 = vrsqrt.f32 %v2349_v28 }
 0xd6d   : > { %v3301_v29 = vpop.eup %3300 }
 0xd6e   : > { %v2351_v46 = vmul.f32 %v3301_v29, %v2344_v24  ;;  %2370 = sbr.rel (%p2880_p12) target bundleno = 3658 (0xe4a), region = 108 }
 0xd70   : > { %v2358_v31 = vmul.f32 %v2878_v30, %v2351_v46 }
 0xd72   : > { %v2365_v32 = vadd.f32 %v2879_v40, %v2358_v31 }
 0xd74   : > { %2366 = vst [vmem:[%s3981_s27] sm:$0xff] %v2365_v32  ;;  %3023 = vmatpush3.msra.mxu0 (!%p2880_p12), %v2365_v32 }
 0xd75   : > { %3025 = vmatmul.mubr.msk.f32.vlgmr.msra.gmra.mrb[0].mxu0 %vm1259_vm2, %v2371_v54 }
 0xe48   : > { %v2441_v43 = vpop.f32.mrb[0].mxu0 }
 0xe49   : > { %2445 = vst [vmem:[%s834_s12] sm:$0x1] %v2441_v43  ;;  %v3026_v44 = vpop.f32.mrb[1].mxu0 }
 0xe4a PF: > { %s4421_s8 = sld [smem:[#allocation20_spill]]  ;;  %s4422_s9 = sld [smem:[#allocation28_spill]] }
 0xe4b   : > { %s4423_s2 = sld [smem:[#allocation48_spill]]  ;;  %s2464_s22 = sshll.u32 %s3981_s27, 4  ;;  %s2465_s22 = int_to_ptr.vmem [resolvable:$true] %s2464_s22 }
 0xe4c   : > { %s2447_s16 = scalar_lea.sflag [#allocation4], %s3914_s24  ;;  %s3392_s17 = scalar_lea.vmem %s2465_s22, 128 }
 0xe4d   : > { %p3393_p7 = scmp.ne.s32.totalorder %s2465_s22, %s3392_s17  ;;  %s3567_s6 = smov [#allocation8]  }
 0xe4e   : > { %s3396_s14 = sshll.u32 %s3567_s6, 4  ;;  %s3397_s14 = int_to_ptr.vmem [resolvable:$false] %s3396_s14 }
 0xe4f   : > { %s3398_s21 = scalar_lea.vmem %s3397_s14, 256  ;;  %p3399_p13 = scmp.lt.s32.totalorder %s2465_s22, %s3397_s14 }
 0xe50   : > { %s2883_s1 = sshll.u32 %s4421_s8, 7  ;;  %p4425_p11 = scmp.ne.s32.totalorder %s4422_s9, 0 }
 0xe51   : > { %s4424_s15 = smov %s4423_s2  ;;  %s4219_s5 = scalar_lea.hbm %s4423_s2, %s2883_s1 }
 0xe52   : > { %p3394_p0 = pnand %p3393_p7, %p4425_p11  ;;  %p3400_p2 = scmp.lt.s32.totalorder %s3398_s21, %s3392_s17 }
 0xe54   : > { %p3395_p1 = pneg %p3394_p0  ;;  %p3401_p6 = por %p3400_p2, %p3399_p13 }
 0xe56   : > { %p3402_p9 = pnand %p3401_p6, %p3395_p1 }
 0xe58   : > { %3405 = shalt.err (!%p3402_p9)
}
 0xe59   : > { %s3406_s27 = scalar_lea.hbm %s4219_s5, 128  ;;  %s3410_s26 = scalar_lea.hbm %s4424_s15, 256 }
 0xe5a   : > { %p3407_p5 = scmp.ne.s32.totalorder %s4219_s5, %s3406_s27  ;;  %p3411_p10 = scmp.lt.u32.totalorder %s4219_s5, %s4424_s15 }
 0xe5b   : > { %p3412_p8 = scmp.lt.u32.totalorder %s3410_s26, %s3406_s27  ;;  %p3414_p7 = scmp.lt.u32.totalorder %s3406_s27, %s4219_s5 }
 0xe5c   : > { %p3408_p3 = pnand %p3407_p5, %p4425_p11 }
 0xe5d   : > { %p3413_p12 = por %p3412_p8, %p3411_p10 }
 0xe5e   : > { %p3409_p4 = pneg %p3408_p3 }
 0xe5f   : > { %p3415_p0 = por %p3414_p7, %p3413_p12 }
 0xe61   : > { %p3416_p1 = pnand %p3415_p0, %p3409_p4 }
 0xe63   : > { %3419 = shalt.err (!%p3416_p1)
}
 0xe64   : > { %3037 = dma.vmem_to_hbm [thread:$0]  (%p4425_p11), %s2465_s22, 128, %s4219_s5, %s2447_s16  }
 0xe65   : > { %s2884_s3 = sshll.u32 %s4421_s8, 4  ;;  %s2477_s30 = sshll.u32 %s834_s12, 4  ;;  %s2478_s30 = int_to_ptr.vmem [resolvable:$true] %s2477_s30 }
 0xe66   : > { %s4426_s4 = sld [smem:[#allocation49_spill]]  ;;  %s2452_s13 = scalar_lea.sflag [#allocation10], %s3914_s24 }
 0xe67   : > { %s3420_s0 = scalar_lea.vmem %s2478_s30, 16  ;;  %s3568_s20 = smov [#allocation9]  }
 0xe68   : > { %p3421_p13 = scmp.ne.s32.totalorder %s2478_s30, %s3420_s0  ;;  %s3424_s1 = sshll.u32 %s3568_s20, 4  ;;  %s3425_s1 = int_to_ptr.vmem [resolvable:$false] %s3424_s1 }
 0xe69   : > { %s3426_s23 = scalar_lea.vmem %s3425_s1, 32  ;;  %p3427_p9 = scmp.lt.s32.totalorder %s2478_s30, %s3425_s1 }
 0xe6a   : > { %p3422_p2 = pnand %p3421_p13, %p4425_p11  ;;  %p3428_p5 = scmp.lt.s32.totalorder %s3426_s23, %s3420_s0 }
 0xe6c   : > { %s4246_s28 = scalar_lea.hbm %s4426_s4, %s2884_s3  ;;  %p3423_p6 = pneg %p3422_p2 }
 0xe6d   : > { %p3429_p3 = por %p3428_p5, %p3427_p9 }
 0xe6f   : > { %p3430_p4 = pnand %p3429_p3, %p3423_p6 }
 0xe71   : > { %3433 = shalt.err (!%p3430_p4)
}
 0xe72   : > { %s3434_s24 = scalar_lea.hbm %s4246_s28, 16  ;;  %s3438_s11 = scalar_lea.hbm %s4426_s4, 32 }
 0xe73   : > { %p3435_p10 = scmp.ne.s32.totalorder %s4246_s28, %s3434_s24  ;;  %p3439_p7 = scmp.lt.u32.totalorder %s4246_s28, %s4426_s4 }
 0xe74   : > { %p3440_p0 = scmp.lt.u32.totalorder %s3438_s11, %s3434_s24  ;;  %p3442_p13 = scmp.lt.u32.totalorder %s3434_s24, %s4246_s28 }
 0xe75   : > { %p3436_p8 = pnand %p3435_p10, %p4425_p11 }
 0xe76   : > { %p3441_p1 = por %p3440_p0, %p3439_p7 }
 0xe77   : > { %p3437_p12 = pneg %p3436_p8 }
 0xe78   : > { %p3443_p2 = por %p3442_p13, %p3441_p1 }
 0xe7a   : > { %p3444_p6 = pnand %p3443_p2, %p3437_p12 }
 0xe7c   : > { %3447 = shalt.err (!%p3444_p6)
}
 0xe7d   : > { %3038 = dma.vmem_to_hbm [thread:$0]  (%p4425_p11), %s2478_s30, 16, %s4246_s28, %s2452_s13  }
 0xe7e PF: > { %s4427_s22 = sld [smem:[#allocation23_spill]]  ;;  %s4428_s16 = sld [smem:[#allocation15_spill]] }
 0xe7f   : > { %s4429_s17 = sld [smem:[#allocation29_spill]] }
 0xe84   : > { %p3059_p9 = scmp.ge.s32.totalorder %s4427_s22, 2  ;;  %s2489_s6 = sand.u32 1, %s4428_s16  }
 0xe85   : > { %p4430_p5 = scmp.ne.s32.totalorder %s4429_s17, 0  ;;  %s2490_s14 = scalar_lea.sflag [#allocation4], %s2489_s6 }
 0xe87   : > { %p3052_p3 = pnand %p3059_p9, %p4430_p5 }
 0xe89   : > { %3501 = dma.done.wait (!%p3052_p3), %s2490_s14, 128  }
 0xe8a   : > { %3503 = vsyncadd (!%p3052_p3), %s2490_s14, 4294967168  ;;  %s2499_s21 = scalar_lea.sflag [#allocation10], %s2489_s6 }
 0xe8b   : > { %3505 = dma.done.wait (!%p3052_p3), %s2499_s21, 16  }
 0xe8c   : > { %3507 = vsyncadd (!%p3052_p3), %s2499_s21, 4294967280  ;;  %s41_s2 = sadd.s32 1, %s4427_s22   ;;  %s4431_s27 = sld [smem:[#allocation16_spill]] }
 0xe8d   : > { %p38_p4 = scmp.ge.s32.totalorder %s41_s2, 6   ;;  %s4432_s28 = sld [smem:[#allocation17_spill]] }
 0xe8e   : > { %s4433_s29 = sld [smem:[#allocation27_spill]]  ;;  %s4434_s30 = sld [smem:[#allocation18_spill]] }
 0xe8f   : > { %s4435_s0 = sld [smem:[#allocation19_spill]]  ;;  %s4436_s19 = sld [smem:[#allocation26_spill]] }
 0xe90   : > { %s4437_s1 = sld [smem:[#allocation21_spill]]  ;;  %s4438_s20 = sld [smem:[#allocation22_spill]] }
 0xe91   : > { %s4439_s21 = sld [smem:[#allocation24_spill]]  ;;  %s4440_s22 = sld [smem:[#allocation25_spill]] }
 0xe92   :  { %40 = sbr.rel (!%p38_p4) target bundleno = 33 (0x21), region = 218 }
 0xe99   :  { %2503 = vsyncpa [#allocation3], 1 }
 0xe9a   :  { %2505 = vsyncpa [#allocation3 + $0x1], 1 }
 0xe9b   :  { %2506 = vsyncpa [#allocation6], 1 }
 0xe9c   :  { %2508 = vsyncpa [#allocation6 + $0x1], 1 }
 0xe9d   :  { %2509 = vsyncpa [#allocation4], 1 }
 0xe9e   :  { %2511 = vsyncpa [#allocation4 + $0x1], 1 }
 0xe9f   :  { %2512 = vsyncpa [#allocation10], 1 }
 0xea0   :  { %2514 = vsyncpa [#allocation10 + $0x1], 1 }

</bundles_post_ra>
